<compile_context>
chip_gen: v5e
topology: v5e:2x2
jax: 0.10.0
libtpu: 0.0.40
codegen_flags: <defaults>
</compile_context>

<pallas_src>
import jax
import jax.numpy as jnp
from jax.experimental import pallas as pl
from jax.experimental.pallas import tpu as pltpu

# ----------------------------- config -----------------------------
VOCAB = 100        # synthetic vocab
MAX_POS = 16       # max sequence length for positional embeddings
HIDDEN = 32        # hidden size
NUM_HEADS = 4      # attention heads
HEAD_DIM = HIDDEN // NUM_HEADS
FFN = 64           # intermediate FFN size
NUM_LAYERS = 2     # transformer layers
NUM_LABELS = 3     # classifier outputs
LN_EPS = 1e-12     # DistilBERT layernorm eps
LANE = 128         # lane-dense output width for the classifier logits
ATT_SCALE = 1.0 / float(HEAD_DIM) ** 0.5

# Column layout of the per-layer fused bf16 weight slab wA[l] (H, WA_COLS):
QKV_OFF, QKV_END = 0, 3 * HIDDEN                 # 0:96   [wq*scale | wk | wv]
WO_OFF, WO_END = 3 * HIDDEN, 4 * HIDDEN          # 96:128  wo
W1_OFF, W1_END = 4 * HIDDEN, 4 * HIDDEN + FFN    # 128:192 w1
WA_COLS = W1_END

# Row layout of the per-layer f32 vector-param slab vec[l] (8, 128):
R_BQKV, R_BO, R_B1, R_B2, R_LN1G, R_LN1B, R_LN2G, R_LN2B = range(8)
# Global slab vec[NUM_LAYERS]:
R_EMBG, R_EMBB, R_CLSB = 0, 1, 2


# ----------------------------- kernel helpers -----------------------------
def _layernorm(x, gamma, beta, eps=LN_EPS):
    mu = jnp.mean(x, axis=-1, keepdims=True)
    var = jnp.mean((x - mu) ** 2, axis=-1, keepdims=True)
    return (x - mu) * jax.lax.rsqrt(var + eps) * gamma + beta


def _gelu(x):
    # TODO(synk): HF DistilBERT uses exact erf-GELU; tanh approximation differs ~1e-3.
    return 0.5 * x * (1.0 + jnp.tanh(0.7978845608028654 * (x + 0.044715 * x * x * x)))


# ----------------------------- fused kernel -----------------------------
def _build_kernel(B, S):
    BS = B * S

    def kernel(x_ref, mb_ref, vec_ref, wA_ref, w2_ref, cw_ref, o_ref):
        """Whole SentimentClassifier forward, full batch, single invocation.

        x:   (BS, H)      f32   word+pos embeddings, batch folded into rows
        mb:  (BS, BS)     f32   additive attention bias (padding + cross-example block)
        vec: (L+1, 8, 128) f32  all biases / LN params / globals (static row layout)
        wA:  (L, H, 192)  bf16  [wqkv(scaled q) | wo | w1]
        w2:  (L, FFN, H)  bf16
        cw:  (H, 128)     bf16  lane-padded classifier weight
        out: (B, 128)     f32   lane-padded logits
        """
        mask_b = mb_ref[...]                                            # (BS, BS)
        emb_g = vec_ref[NUM_LAYERS, R_EMBG:R_EMBG + 1, 0:HIDDEN]
        emb_b = vec_ref[NUM_LAYERS, R_EMBB:R_EMBB + 1, 0:HIDDEN]
        cls_b = vec_ref[NUM_LAYERS, R_CLSB:R_CLSB + 1, :]               # (1, 128)

        # embeddings.LayerNorm
        h = _layernorm(x_ref[...], emb_g, emb_b)                        # (BS, H)

        # Static unroll over layers (L=2).
        # TODO(synk): if scaled to real DistilBERT (H=768, FFN=3072, L=6), make the
        # layer dim a grid axis (streamed, double-buffered) and raise vmem_limit_bytes;
        # all-layers-resident weights would not fit v7x's 64 MiB VMEM.
        for l in range(NUM_LAYERS):
            last = l == NUM_LAYERS - 1
            hb = h.astype(jnp.bfloat16)

            # fused Q/K/V: one (BS,H)x(H,3H) MXU pass; ATT_SCALE pre-folded into Q
            qkv = (jnp.dot(hb, wA_ref[l, :, QKV_OFF:QKV_END],
                           preferred_element_type=jnp.float32)
                   + vec_ref[l, R_BQKV:R_BQKV + 1, 0:3 * HIDDEN])       # (BS, 3H)
            q = qkv[:, 0:HIDDEN]
            kb = qkv[:, HIDDEN:2 * HIDDEN].astype(jnp.bfloat16)
            vb = qkv[:, 2 * HIDDEN:3 * HIDDEN].astype(jnp.bfloat16)

            if last:
                # only CLS rows feed the classifier: restrict queries / residual
                # stream to rows {0, S, ...}; keys/values stay full-length.
                q = q.reshape(B, S, HIDDEN)[:, 0, :]                    # (B, H)
                resid = h.reshape(B, S, HIDDEN)[:, 0, :]                # (B, H)
                mb = mask_b.reshape(B, S, BS)[:, 0, :]                  # (B, BS)
            else:
                resid, mb = h, mask_b
            qb = q.astype(jnp.bfloat16)

            # per-head attention from lane-contiguous 8-wide slices (no stack /
            # transpose); cross-example isolation comes from the block-diag mask.
            ctx_heads = []
            for n in range(NUM_HEADS):
                sl = slice(n * HEAD_DIM, (n + 1) * HEAD_DIM)
                s = jnp.einsum('qd,kd->qk', qb[:, sl], kb[:, sl],
                               preferred_element_type=jnp.float32) + mb
                s = s - jnp.max(s, axis=-1, keepdims=True)
                p = jnp.exp(s)
                # TODO(synk): approx reciprocal (EUP) adds tiny softmax error; set
                # approx=False for strict numerical parity with a torch reference.
                p = p * pl.reciprocal(jnp.sum(p, axis=-1, keepdims=True),
                                      approx=True)
                ctx_heads.append(jnp.dot(p.astype(jnp.bfloat16), vb[:, sl],
                                         preferred_element_type=jnp.float32))
            ctx = jnp.concatenate(ctx_heads, axis=-1).astype(jnp.bfloat16)  # (rows, H)

            # single (rows,H)x(H,H) output projection on lane-concatenated heads
            sa = (jnp.dot(ctx, wA_ref[l, :, WO_OFF:WO_END],
                          preferred_element_type=jnp.float32)
                  + vec_ref[l, R_BO:R_BO + 1, 0:HIDDEN])
            h1 = _layernorm(resid + sa,
                            vec_ref[l, R_LN1G:R_LN1G + 1, 0:HIDDEN],
                            vec_ref[l, R_LN1B:R_LN1B + 1, 0:HIDDEN])

            ff = _gelu(jnp.dot(h1.astype(jnp.bfloat16),
                               wA_ref[l, :, W1_OFF:W1_END],
                               preferred_element_type=jnp.float32)
                       + vec_ref[l, R_B1:R_B1 + 1, 0:FFN])
            ff = (jnp.dot(ff.astype(jnp.bfloat16), w2_ref[l],
                          preferred_element_type=jnp.float32)
                  + vec_ref[l, R_B2:R_B2 + 1, 0:HIDDEN])
            h = _layernorm(h1 + ff,
                           vec_ref[l, R_LN2G:R_LN2G + 1, 0:HIDDEN],
                           vec_ref[l, R_LN2B:R_LN2B + 1, 0:HIDDEN])

        # After the CLS-restricted last layer, h is (B, H): the CLS hidden states.
        # TODO(synk): dropout (p=0.3) is identity at inference; training-mode RNG dropout omitted.
        logits = (jnp.dot(h.astype(jnp.bfloat16), cw_ref[...],
                          preferred_element_type=jnp.float32) + cls_b)  # (B, 128)
        o_ref[...] = logits                                             # lane-dense store

    return kernel


# ----------------------------- parameters -----------------------------
def init_params(key):
    def normal(k, shape, scale=0.02):
        return scale * jax.random.normal(k, shape, dtype=jnp.float32)

    # TODO(synk): pretrained 'distilbert-base-uncased' weights replaced by synthetic init
    # (no file/network access); structure/semantics match a tiny DistilBERT.
    keys = jax.random.split(key, 4 + NUM_LAYERS)
    params = {
        'word_emb': normal(keys[0], (VOCAB, HIDDEN)),
        'pos_emb': normal(keys[1], (MAX_POS, HIDDEN)),
        'emb_ln_g': jnp.ones((1, HIDDEN), jnp.float32),
        'emb_ln_b': jnp.zeros((1, HIDDEN), jnp.float32),
        'cls_w': normal(keys[2], (HIDDEN, NUM_LABELS)),
        'cls_b': jnp.zeros((1, NUM_LABELS), jnp.float32),
        'layers': [],
    }
    for li in range(NUM_LAYERS):
        lk = jax.random.split(keys[4 + li], 6)
        params['layers'].append({
            'wq': normal(lk[0], (HIDDEN, HIDDEN)), 'bq': jnp.zeros((1, HIDDEN), jnp.float32),
            'wk': normal(lk[1], (HIDDEN, HIDDEN)), 'bk': jnp.zeros((1, HIDDEN), jnp.float32),
            'wv': normal(lk[2], (HIDDEN, HIDDEN)), 'bv': jnp.zeros((1, HIDDEN), jnp.float32),
            'wo': normal(lk[3], (HIDDEN, HIDDEN)), 'bo': jnp.zeros((1, HIDDEN), jnp.float32),
            'ln1_g': jnp.ones((1, HIDDEN), jnp.float32), 'ln1_b': jnp.zeros((1, HIDDEN), jnp.float32),
            'w1': normal(lk[4], (HIDDEN, FFN)), 'b1': jnp.zeros((1, FFN), jnp.float32),
            'w2': normal(lk[5], (FFN, HIDDEN)), 'b2': jnp.zeros((1, HIDDEN), jnp.float32),
            'ln2_g': jnp.ones((1, HIDDEN), jnp.float32), 'ln2_b': jnp.zeros((1, HIDDEN), jnp.float32),
        })
    return params


def prepare_params(params):
    """Pack parameters into 4 kernel inputs: bf16 weight slab [wqkv|wo|w1] (with
    ATT_SCALE folded into q), stacked w2, one f32 vector-param slab, lane-padded
    classifier weight."""
    L = NUM_LAYERS
    wA = jnp.zeros((L, HIDDEN, WA_COLS), jnp.float32)
    vec = jnp.zeros((L + 1, 8, 128), jnp.float32)
    for l, lp in enumerate(params['layers']):
        wqkv = jnp.concatenate([lp['wq'] * ATT_SCALE, lp['wk'], lp['wv']], axis=1)
        bqkv = jnp.concatenate([lp['bq'] * ATT_SCALE, lp['bk'], lp['bv']], axis=1)[0]
        wA = wA.at[l, :, QKV_OFF:QKV_END].set(wqkv)
        wA = wA.at[l, :, WO_OFF:WO_END].set(lp['wo'])
        wA = wA.at[l, :, W1_OFF:W1_END].set(lp['w1'])
        vec = vec.at[l, R_BQKV, 0:3 * HIDDEN].set(bqkv)
        vec = vec.at[l, R_BO, 0:HIDDEN].set(lp['bo'][0])
        vec = vec.at[l, R_B1, 0:FFN].set(lp['b1'][0])
        vec = vec.at[l, R_B2, 0:HIDDEN].set(lp['b2'][0])
        vec = vec.at[l, R_LN1G, 0:HIDDEN].set(lp['ln1_g'][0])
        vec = vec.at[l, R_LN1B, 0:HIDDEN].set(lp['ln1_b'][0])
        vec = vec.at[l, R_LN2G, 0:HIDDEN].set(lp['ln2_g'][0])
        vec = vec.at[l, R_LN2B, 0:HIDDEN].set(lp['ln2_b'][0])
    vec = vec.at[L, R_EMBG, 0:HIDDEN].set(params['emb_ln_g'][0])
    vec = vec.at[L, R_EMBB, 0:HIDDEN].set(params['emb_ln_b'][0])
    vec = vec.at[L, R_CLSB, 0:NUM_LABELS].set(params['cls_b'][0])

    w2 = jnp.stack([lp['w2'] for lp in params['layers']], axis=0)
    cls_w = jnp.zeros((HIDDEN, LANE), jnp.float32).at[:, :NUM_LABELS].set(params['cls_w'])
    return {
        'word_emb': params['word_emb'],
        'pos_emb': params['pos_emb'],
        'wA': wA.astype(jnp.bfloat16),
        'w2': w2.astype(jnp.bfloat16),
        'vec': vec,
        'cls_w': cls_w.astype(jnp.bfloat16),
    }


# ----------------------------- forward -----------------------------
@jax.jit
def sentiment_classifier_forward(prep, input_ids, attention_mask):
    B, S = input_ids.shape
    BS = B * S

    # Embedding gather (plain-JAX glue); batch folded into rows for the kernel.
    x = (jnp.take(prep['word_emb'], input_ids, axis=0)
         + prep['pos_emb'][:S][None, :, :]).astype(jnp.float32)          # (B, S, H)
    x2 = x.reshape(BS, HIDDEN)

    # Additive attention bias over the folded (BS, BS) score matrix:
    # 0 where key is in the same example AND unmasked, else -1e9.
    m = attention_mask.astype(jnp.float32)                               # (B, S)
    allow = jnp.eye(B, dtype=jnp.float32)[:, None, :, None] * m[None, None, :, :]
    bias = ((1.0 - jnp.broadcast_to(allow, (B, S, B, S))) * (-1e9)).reshape(BS, BS)

    kernel = _build_kernel(B, S)
    out = pl.pallas_call(
        kernel,
        out_shape=jax.ShapeDtypeStruct((B, LANE), jnp.float32),
        in_specs=[pl.BlockSpec(memory_space=pltpu.MemorySpace.VMEM)] * 6,
        out_specs=pl.BlockSpec(memory_space=pltpu.MemorySpace.VMEM),
    )(x2, bias, prep['vec'], prep['wA'], prep['w2'], prep['cls_w'])

    return out[:, :NUM_LABELS]                                           # (B, num_labels)


# ----------------------------- main -----------------------------
if __name__ == "__main__":
    key = jax.random.PRNGKey(0)
    pkey, ikey = jax.random.split(key)

    params = init_params(pkey)
    prep = prepare_params(params)

    B, S = 2, 8
    input_ids = jax.random.randint(ikey, (B, S), 0, VOCAB, dtype=jnp.int32)
    attention_mask = jnp.ones((B, S), dtype=jnp.int32)
    attention_mask = attention_mask.at[1, 6:].set(0)   # pad-mask the tail of example 1

    logits = sentiment_classifier_forward(prep, input_ids, attention_mask)
    jax.block_until_ready(logits)
    assert logits.shape == (B, NUM_LABELS)
    assert bool(jnp.all(jnp.isfinite(logits)))
    print("KERNEL_OK")
</pallas_src>

<mosaic_0001>
module attributes {stable_mosaic.version = 11 : i64} {
  func.func @kernel(%arg0: memref<16x32xf32, #tpu.memory_space<vmem>>, %arg1: memref<16x16xf32, #tpu.memory_space<vmem>>, %arg2: memref<3x8x128xf32, #tpu.memory_space<vmem>>, %arg3: memref<2x32x192xbf16, #tpu.memory_space<vmem>>, %arg4: memref<2x64x32xbf16, #tpu.memory_space<vmem>>, %arg5: memref<32x128xbf16, #tpu.memory_space<vmem>>, %arg6: memref<2x128xf32, #tpu.memory_space<vmem>>) attributes {dimension_semantics = [], scalar_prefetch = 0 : i64, scratch_operands = 0 : i64, tpu.core_type = #tpu.core_type<tc>} {
    %c0 = arith.constant 0 : index
    %c0_0 = arith.constant 0 : index
    %0 = vector.load %arg1[%c0, %c0_0] : memref<16x16xf32, #tpu.memory_space<vmem>>, vector<16x16xf32>
    %c2 = arith.constant 2 : index
    %c0_1 = arith.constant 0 : index
    %c0_2 = arith.constant 0 : index
    %1 = vector.load %arg2[%c2, %c0_1, %c0_2] : memref<3x8x128xf32, #tpu.memory_space<vmem>>, vector<1x1x32xf32>
    %2 = vector.shape_cast %1 : vector<1x1x32xf32> to vector<1x32xf32>
    %c2_3 = arith.constant 2 : index
    %c1 = arith.constant 1 : index
    %c0_4 = arith.constant 0 : index
    %3 = vector.load %arg2[%c2_3, %c1, %c0_4] : memref<3x8x128xf32, #tpu.memory_space<vmem>>, vector<1x1x32xf32>
    %4 = vector.shape_cast %3 : vector<1x1x32xf32> to vector<1x32xf32>
    %c2_5 = arith.constant 2 : index
    %c2_6 = arith.constant 2 : index
    %c0_7 = arith.constant 0 : index
    %5 = vector.load %arg2[%c2_5, %c2_6, %c0_7] : memref<3x8x128xf32, #tpu.memory_space<vmem>>, vector<1x1x128xf32>
    %6 = vector.shape_cast %5 : vector<1x1x128xf32> to vector<1x128xf32>
    %c0_8 = arith.constant 0 : index
    %c0_9 = arith.constant 0 : index
    %7 = vector.load %arg0[%c0_8, %c0_9] : memref<16x32xf32, #tpu.memory_space<vmem>>, vector<16x32xf32>
    %cst = arith.constant dense<0.000000e+00> : vector<16xf32>
    %8 = vector.multi_reduction <add>, %7, %cst [1] : vector<16x32xf32> to vector<16xf32>
    %9 = vector.shape_cast %8 : vector<16xf32> to vector<16x1xf32>
    %cst_10 = arith.constant 3.200000e+01 : f32
    %10 = vector.broadcast %cst_10 : f32 to vector<16x1xf32>
    %11 = arith.divf %9, %10 : vector<16x1xf32>
    %12 = vector.broadcast %11 : vector<16x1xf32> to vector<16x32xf32>
    %13 = arith.subf %7, %12 : vector<16x32xf32>
    %14 = arith.mulf %13, %13 : vector<16x32xf32>
    %cst_11 = arith.constant dense<0.000000e+00> : vector<16xf32>
    %15 = vector.multi_reduction <add>, %14, %cst_11 [1] : vector<16x32xf32> to vector<16xf32>
    %16 = vector.shape_cast %15 : vector<16xf32> to vector<16x1xf32>
    %cst_12 = arith.constant 3.200000e+01 : f32
    %17 = vector.broadcast %cst_12 : f32 to vector<16x1xf32>
    %18 = arith.divf %16, %17 : vector<16x1xf32>
    %19 = vector.broadcast %11 : vector<16x1xf32> to vector<16x32xf32>
    %20 = arith.subf %7, %19 : vector<16x32xf32>
    %cst_13 = arith.constant 9.99999996E-13 : f32
    %21 = vector.broadcast %cst_13 : f32 to vector<16x1xf32>
    %22 = arith.addf %18, %21 : vector<16x1xf32>
    %23 = math.rsqrt %22 : vector<16x1xf32>
    %24 = vector.broadcast %23 : vector<16x1xf32> to vector<16x32xf32>
    %25 = arith.mulf %20, %24 : vector<16x32xf32>
    %26 = vector.broadcast %2 : vector<1x32xf32> to vector<16x32xf32>
    %27 = arith.mulf %25, %26 : vector<16x32xf32>
    %28 = vector.broadcast %4 : vector<1x32xf32> to vector<16x32xf32>
    %29 = arith.addf %27, %28 : vector<16x32xf32>
    %30 = arith.truncf %29 : vector<16x32xf32> to vector<16x32xbf16>
    %c0_14 = arith.constant 0 : index
    %c0_15 = arith.constant 0 : index
    %c0_16 = arith.constant 0 : index
    %31 = vector.load %arg3[%c0_14, %c0_15, %c0_16] : memref<2x32x192xbf16, #tpu.memory_space<vmem>>, vector<1x32x96xbf16>
    %32 = vector.shape_cast %31 : vector<1x32x96xbf16> to vector<32x96xbf16>
    %cst_17 = arith.constant dense<0.000000e+00> : vector<16x96xf32>
    %33 = tpu.matmul %30, %32, %cst_17 {dimension_numbers = #tpu.dot_dimension_numbers<[1], [0], [0], [1], [0, 0, 1, 1], [], []>} : vector<16x32xbf16>, vector<32x96xbf16>, vector<16x96xf32> -> vector<16x96xf32>
    %c0_18 = arith.constant 0 : index
    %c0_19 = arith.constant 0 : index
    %c0_20 = arith.constant 0 : index
    %34 = vector.load %arg2[%c0_18, %c0_19, %c0_20] : memref<3x8x128xf32, #tpu.memory_space<vmem>>, vector<1x1x96xf32>
    %35 = vector.shape_cast %34 : vector<1x1x96xf32> to vector<1x96xf32>
    %36 = vector.broadcast %35 : vector<1x96xf32> to vector<16x96xf32>
    %37 = arith.addf %33, %36 : vector<16x96xf32>
    %38 = vector.extract_strided_slice %37 {offsets = [0, 0], sizes = [16, 32], strides = [1, 1]} : vector<16x96xf32> to vector<16x32xf32>
    %39 = vector.extract_strided_slice %37 {offsets = [0, 32], sizes = [16, 32], strides = [1, 1]} : vector<16x96xf32> to vector<16x32xf32>
    %40 = arith.truncf %39 : vector<16x32xf32> to vector<16x32xbf16>
    %41 = vector.extract_strided_slice %37 {offsets = [0, 64], sizes = [16, 32], strides = [1, 1]} : vector<16x96xf32> to vector<16x32xf32>
    %42 = arith.truncf %41 : vector<16x32xf32> to vector<16x32xbf16>
    %43 = arith.truncf %38 : vector<16x32xf32> to vector<16x32xbf16>
    %44 = vector.extract_strided_slice %43 {offsets = [0, 0], sizes = [16, 8], strides = [1, 1]} : vector<16x32xbf16> to vector<16x8xbf16>
    %45 = vector.extract_strided_slice %40 {offsets = [0, 0], sizes = [16, 8], strides = [1, 1]} : vector<16x32xbf16> to vector<16x8xbf16>
    "tpu.trace_start"() <{level = 10 : i32, message = "qd,kd->qk"}> : () -> ()
    %cst_21 = arith.constant dense<0.000000e+00> : vector<16x16xf32>
    %46 = tpu.matmul %44, %45, %cst_21 {dimension_numbers = #tpu.dot_dimension_numbers<[1], [1], [0], [0], [0, 0, 1, 0], [], []>} : vector<16x8xbf16>, vector<16x8xbf16>, vector<16x16xf32> -> vector<16x16xf32>
    "tpu.trace_stop"() : () -> ()
    %47 = arith.addf %46, %0 : vector<16x16xf32>
    %cst_22 = arith.constant dense<0xFF800000> : vector<16xf32>
    %48 = vector.multi_reduction <maximumf>, %47, %cst_22 [1] : vector<16x16xf32> to vector<16xf32>
    %49 = vector.shape_cast %48 : vector<16xf32> to vector<16x1xf32>
    %50 = vector.broadcast %49 : vector<16x1xf32> to vector<16x16xf32>
    %51 = arith.subf %47, %50 : vector<16x16xf32>
    %52 = math.exp %51 : vector<16x16xf32>
    %cst_23 = arith.constant dense<0.000000e+00> : vector<16xf32>
    %53 = vector.multi_reduction <add>, %52, %cst_23 [1] : vector<16x16xf32> to vector<16xf32>
    %54 = vector.shape_cast %53 : vector<16xf32> to vector<16x1xf32>
    %55 = tpu.reciprocal %54 {approx = true} : vector<16x1xf32> -> vector<16x1xf32>
    %56 = vector.broadcast %55 : vector<16x1xf32> to vector<16x16xf32>
    %57 = arith.mulf %52, %56 : vector<16x16xf32>
    %58 = arith.truncf %57 : vector<16x16xf32> to vector<16x16xbf16>
    %59 = vector.extract_strided_slice %42 {offsets = [0, 0], sizes = [16, 8], strides = [1, 1]} : vector<16x32xbf16> to vector<16x8xbf16>
    %cst_24 = arith.constant dense<0.000000e+00> : vector<16x8xf32>
    %60 = tpu.matmul %58, %59, %cst_24 {dimension_numbers = #tpu.dot_dimension_numbers<[1], [0], [0], [1], [0, 0, 1, 1], [], []>} : vector<16x16xbf16>, vector<16x8xbf16>, vector<16x8xf32> -> vector<16x8xf32>
    %61 = vector.extract_strided_slice %43 {offsets = [0, 8], sizes = [16, 8], strides = [1, 1]} : vector<16x32xbf16> to vector<16x8xbf16>
    %62 = vector.extract_strided_slice %40 {offsets = [0, 8], sizes = [16, 8], strides = [1, 1]} : vector<16x32xbf16> to vector<16x8xbf16>
    "tpu.trace_start"() <{level = 10 : i32, message = "qd,kd->qk"}> : () -> ()
    %cst_25 = arith.constant dense<0.000000e+00> : vector<16x16xf32>
    %63 = tpu.matmul %61, %62, %cst_25 {dimension_numbers = #tpu.dot_dimension_numbers<[1], [1], [0], [0], [0, 0, 1, 0], [], []>} : vector<16x8xbf16>, vector<16x8xbf16>, vector<16x16xf32> -> vector<16x16xf32>
    "tpu.trace_stop"() : () -> ()
    %64 = arith.addf %63, %0 : vector<16x16xf32>
    %cst_26 = arith.constant dense<0xFF800000> : vector<16xf32>
    %65 = vector.multi_reduction <maximumf>, %64, %cst_26 [1] : vector<16x16xf32> to vector<16xf32>
    %66 = vector.shape_cast %65 : vector<16xf32> to vector<16x1xf32>
    %67 = vector.broadcast %66 : vector<16x1xf32> to vector<16x16xf32>
    %68 = arith.subf %64, %67 : vector<16x16xf32>
    %69 = math.exp %68 : vector<16x16xf32>
    %cst_27 = arith.constant dense<0.000000e+00> : vector<16xf32>
    %70 = vector.multi_reduction <add>, %69, %cst_27 [1] : vector<16x16xf32> to vector<16xf32>
    %71 = vector.shape_cast %70 : vector<16xf32> to vector<16x1xf32>
    %72 = tpu.reciprocal %71 {approx = true} : vector<16x1xf32> -> vector<16x1xf32>
    %73 = vector.broadcast %72 : vector<16x1xf32> to vector<16x16xf32>
    %74 = arith.mulf %69, %73 : vector<16x16xf32>
    %75 = arith.truncf %74 : vector<16x16xf32> to vector<16x16xbf16>
    %76 = vector.extract_strided_slice %42 {offsets = [0, 8], sizes = [16, 8], strides = [1, 1]} : vector<16x32xbf16> to vector<16x8xbf16>
    %cst_28 = arith.constant dense<0.000000e+00> : vector<16x8xf32>
    %77 = tpu.matmul %75, %76, %cst_28 {dimension_numbers = #tpu.dot_dimension_numbers<[1], [0], [0], [1], [0, 0, 1, 1], [], []>} : vector<16x16xbf16>, vector<16x8xbf16>, vector<16x8xf32> -> vector<16x8xf32>
    %78 = vector.extract_strided_slice %43 {offsets = [0, 16], sizes = [16, 8], strides = [1, 1]} : vector<16x32xbf16> to vector<16x8xbf16>
    %79 = vector.extract_strided_slice %40 {offsets = [0, 16], sizes = [16, 8], strides = [1, 1]} : vector<16x32xbf16> to vector<16x8xbf16>
    "tpu.trace_start"() <{level = 10 : i32, message = "qd,kd->qk"}> : () -> ()
    %cst_29 = arith.constant dense<0.000000e+00> : vector<16x16xf32>
    %80 = tpu.matmul %78, %79, %cst_29 {dimension_numbers = #tpu.dot_dimension_numbers<[1], [1], [0], [0], [0, 0, 1, 0], [], []>} : vector<16x8xbf16>, vector<16x8xbf16>, vector<16x16xf32> -> vector<16x16xf32>
    "tpu.trace_stop"() : () -> ()
    %81 = arith.addf %80, %0 : vector<16x16xf32>
    %cst_30 = arith.constant dense<0xFF800000> : vector<16xf32>
    %82 = vector.multi_reduction <maximumf>, %81, %cst_30 [1] : vector<16x16xf32> to vector<16xf32>
    %83 = vector.shape_cast %82 : vector<16xf32> to vector<16x1xf32>
    %84 = vector.broadcast %83 : vector<16x1xf32> to vector<16x16xf32>
    %85 = arith.subf %81, %84 : vector<16x16xf32>
    %86 = math.exp %85 : vector<16x16xf32>
    %cst_31 = arith.constant dense<0.000000e+00> : vector<16xf32>
    %87 = vector.multi_reduction <add>, %86, %cst_31 [1] : vector<16x16xf32> to vector<16xf32>
    %88 = vector.shape_cast %87 : vector<16xf32> to vector<16x1xf32>
    %89 = tpu.reciprocal %88 {approx = true} : vector<16x1xf32> -> vector<16x1xf32>
    %90 = vector.broadcast %89 : vector<16x1xf32> to vector<16x16xf32>
    %91 = arith.mulf %86, %90 : vector<16x16xf32>
    %92 = arith.truncf %91 : vector<16x16xf32> to vector<16x16xbf16>
    %93 = vector.extract_strided_slice %42 {offsets = [0, 16], sizes = [16, 8], strides = [1, 1]} : vector<16x32xbf16> to vector<16x8xbf16>
    %cst_32 = arith.constant dense<0.000000e+00> : vector<16x8xf32>
    %94 = tpu.matmul %92, %93, %cst_32 {dimension_numbers = #tpu.dot_dimension_numbers<[1], [0], [0], [1], [0, 0, 1, 1], [], []>} : vector<16x16xbf16>, vector<16x8xbf16>, vector<16x8xf32> -> vector<16x8xf32>
    %95 = vector.extract_strided_slice %43 {offsets = [0, 24], sizes = [16, 8], strides = [1, 1]} : vector<16x32xbf16> to vector<16x8xbf16>
    %96 = vector.extract_strided_slice %40 {offsets = [0, 24], sizes = [16, 8], strides = [1, 1]} : vector<16x32xbf16> to vector<16x8xbf16>
    "tpu.trace_start"() <{level = 10 : i32, message = "qd,kd->qk"}> : () -> ()
    %cst_33 = arith.constant dense<0.000000e+00> : vector<16x16xf32>
    %97 = tpu.matmul %95, %96, %cst_33 {dimension_numbers = #tpu.dot_dimension_numbers<[1], [1], [0], [0], [0, 0, 1, 0], [], []>} : vector<16x8xbf16>, vector<16x8xbf16>, vector<16x16xf32> -> vector<16x16xf32>
    "tpu.trace_stop"() : () -> ()
    %98 = arith.addf %97, %0 : vector<16x16xf32>
    %cst_34 = arith.constant dense<0xFF800000> : vector<16xf32>
    %99 = vector.multi_reduction <maximumf>, %98, %cst_34 [1] : vector<16x16xf32> to vector<16xf32>
    %100 = vector.shape_cast %99 : vector<16xf32> to vector<16x1xf32>
    %101 = vector.broadcast %100 : vector<16x1xf32> to vector<16x16xf32>
    %102 = arith.subf %98, %101 : vector<16x16xf32>
    %103 = math.exp %102 : vector<16x16xf32>
    %cst_35 = arith.constant dense<0.000000e+00> : vector<16xf32>
    %104 = vector.multi_reduction <add>, %103, %cst_35 [1] : vector<16x16xf32> to vector<16xf32>
    %105 = vector.shape_cast %104 : vector<16xf32> to vector<16x1xf32>
    %106 = tpu.reciprocal %105 {approx = true} : vector<16x1xf32> -> vector<16x1xf32>
    %107 = vector.broadcast %106 : vector<16x1xf32> to vector<16x16xf32>
    %108 = arith.mulf %103, %107 : vector<16x16xf32>
    %109 = arith.truncf %108 : vector<16x16xf32> to vector<16x16xbf16>
    %110 = vector.extract_strided_slice %42 {offsets = [0, 24], sizes = [16, 8], strides = [1, 1]} : vector<16x32xbf16> to vector<16x8xbf16>
    %cst_36 = arith.constant dense<0.000000e+00> : vector<16x8xf32>
    %111 = tpu.matmul %109, %110, %cst_36 {dimension_numbers = #tpu.dot_dimension_numbers<[1], [0], [0], [1], [0, 0, 1, 1], [], []>} : vector<16x16xbf16>, vector<16x8xbf16>, vector<16x8xf32> -> vector<16x8xf32>
    %112 = tpu.concatenate %60, %77, %94, %111 in 1 : vector<16x8xf32>, vector<16x8xf32>, vector<16x8xf32>, vector<16x8xf32> -> vector<16x32xf32>
    %113 = arith.truncf %112 : vector<16x32xf32> to vector<16x32xbf16>
    %c0_37 = arith.constant 0 : index
    %c0_38 = arith.constant 0 : index
    %c96 = arith.constant 96 : index
    %114 = vector.load %arg3[%c0_37, %c0_38, %c96] : memref<2x32x192xbf16, #tpu.memory_space<vmem>>, vector<1x32x32xbf16>
    %115 = vector.shape_cast %114 : vector<1x32x32xbf16> to vector<32x32xbf16>
    %cst_39 = arith.constant dense<0.000000e+00> : vector<16x32xf32>
    %116 = tpu.matmul %113, %115, %cst_39 {dimension_numbers = #tpu.dot_dimension_numbers<[1], [0], [0], [1], [0, 0, 1, 1], [], []>} : vector<16x32xbf16>, vector<32x32xbf16>, vector<16x32xf32> -> vector<16x32xf32>
    %c0_40 = arith.constant 0 : index
    %c1_41 = arith.constant 1 : index
    %c0_42 = arith.constant 0 : index
    %117 = vector.load %arg2[%c0_40, %c1_41, %c0_42] : memref<3x8x128xf32, #tpu.memory_space<vmem>>, vector<1x1x32xf32>
    %118 = vector.shape_cast %117 : vector<1x1x32xf32> to vector<1x32xf32>
    %119 = vector.broadcast %118 : vector<1x32xf32> to vector<16x32xf32>
    %120 = arith.addf %116, %119 : vector<16x32xf32>
    %121 = arith.addf %29, %120 : vector<16x32xf32>
    %c0_43 = arith.constant 0 : index
    %c4 = arith.constant 4 : index
    %c0_44 = arith.constant 0 : index
    %122 = vector.load %arg2[%c0_43, %c4, %c0_44] : memref<3x8x128xf32, #tpu.memory_space<vmem>>, vector<1x1x32xf32>
    %123 = vector.shape_cast %122 : vector<1x1x32xf32> to vector<1x32xf32>
    %c0_45 = arith.constant 0 : index
    %c5 = arith.constant 5 : index
    %c0_46 = arith.constant 0 : index
    %124 = vector.load %arg2[%c0_45, %c5, %c0_46] : memref<3x8x128xf32, #tpu.memory_space<vmem>>, vector<1x1x32xf32>
    %125 = vector.shape_cast %124 : vector<1x1x32xf32> to vector<1x32xf32>
    %cst_47 = arith.constant dense<0.000000e+00> : vector<16xf32>
    %126 = vector.multi_reduction <add>, %121, %cst_47 [1] : vector<16x32xf32> to vector<16xf32>
    %127 = vector.shape_cast %126 : vector<16xf32> to vector<16x1xf32>
    %cst_48 = arith.constant 3.200000e+01 : f32
    %128 = vector.broadcast %cst_48 : f32 to vector<16x1xf32>
    %129 = arith.divf %127, %128 : vector<16x1xf32>
    %130 = vector.broadcast %129 : vector<16x1xf32> to vector<16x32xf32>
    %131 = arith.subf %121, %130 : vector<16x32xf32>
    %132 = arith.mulf %131, %131 : vector<16x32xf32>
    %cst_49 = arith.constant dense<0.000000e+00> : vector<16xf32>
    %133 = vector.multi_reduction <add>, %132, %cst_49 [1] : vector<16x32xf32> to vector<16xf32>
    %134 = vector.shape_cast %133 : vector<16xf32> to vector<16x1xf32>
    %cst_50 = arith.constant 3.200000e+01 : f32
    %135 = vector.broadcast %cst_50 : f32 to vector<16x1xf32>
    %136 = arith.divf %134, %135 : vector<16x1xf32>
    %137 = vector.broadcast %129 : vector<16x1xf32> to vector<16x32xf32>
    %138 = arith.subf %121, %137 : vector<16x32xf32>
    %cst_51 = arith.constant 9.99999996E-13 : f32
    %139 = vector.broadcast %cst_51 : f32 to vector<16x1xf32>
    %140 = arith.addf %136, %139 : vector<16x1xf32>
    %141 = math.rsqrt %140 : vector<16x1xf32>
    %142 = vector.broadcast %141 : vector<16x1xf32> to vector<16x32xf32>
    %143 = arith.mulf %138, %142 : vector<16x32xf32>
    %144 = vector.broadcast %123 : vector<1x32xf32> to vector<16x32xf32>
    %145 = arith.mulf %143, %144 : vector<16x32xf32>
    %146 = vector.broadcast %125 : vector<1x32xf32> to vector<16x32xf32>
    %147 = arith.addf %145, %146 : vector<16x32xf32>
    %148 = arith.truncf %147 : vector<16x32xf32> to vector<16x32xbf16>
    %c0_52 = arith.constant 0 : index
    %c0_53 = arith.constant 0 : index
    %c128 = arith.constant 128 : index
    %149 = vector.load %arg3[%c0_52, %c0_53, %c128] : memref<2x32x192xbf16, #tpu.memory_space<vmem>>, vector<1x32x64xbf16>
    %150 = vector.shape_cast %149 : vector<1x32x64xbf16> to vector<32x64xbf16>
    %cst_54 = arith.constant dense<0.000000e+00> : vector<16x64xf32>
    %151 = tpu.matmul %148, %150, %cst_54 {dimension_numbers = #tpu.dot_dimension_numbers<[1], [0], [0], [1], [0, 0, 1, 1], [], []>} : vector<16x32xbf16>, vector<32x64xbf16>, vector<16x64xf32> -> vector<16x64xf32>
    %c0_55 = arith.constant 0 : index
    %c2_56 = arith.constant 2 : index
    %c0_57 = arith.constant 0 : index
    %152 = vector.load %arg2[%c0_55, %c2_56, %c0_57] : memref<3x8x128xf32, #tpu.memory_space<vmem>>, vector<1x1x64xf32>
    %153 = vector.shape_cast %152 : vector<1x1x64xf32> to vector<1x64xf32>
    %154 = vector.broadcast %153 : vector<1x64xf32> to vector<16x64xf32>
    %155 = arith.addf %151, %154 : vector<16x64xf32>
    %cst_58 = arith.constant 5.000000e-01 : f32
    %156 = vector.broadcast %cst_58 : f32 to vector<16x64xf32>
    %157 = arith.mulf %156, %155 : vector<16x64xf32>
    %cst_59 = arith.constant 4.471500e-02 : f32
    %158 = vector.broadcast %cst_59 : f32 to vector<16x64xf32>
    %159 = arith.mulf %158, %155 : vector<16x64xf32>
    %160 = arith.mulf %159, %155 : vector<16x64xf32>
    %161 = arith.mulf %160, %155 : vector<16x64xf32>
    %162 = arith.addf %155, %161 : vector<16x64xf32>
    %cst_60 = arith.constant 0.797884583 : f32
    %163 = vector.broadcast %cst_60 : f32 to vector<16x64xf32>
    %164 = arith.mulf %163, %162 : vector<16x64xf32>
    %165 = math.tanh %164 : vector<16x64xf32>
    %cst_61 = arith.constant 1.000000e+00 : f32
    %166 = vector.broadcast %cst_61 : f32 to vector<16x64xf32>
    %167 = arith.addf %166, %165 : vector<16x64xf32>
    %168 = arith.mulf %157, %167 : vector<16x64xf32>
    %169 = arith.truncf %168 : vector<16x64xf32> to vector<16x64xbf16>
    %c0_62 = arith.constant 0 : index
    %c0_63 = arith.constant 0 : index
    %c0_64 = arith.constant 0 : index
    %170 = vector.load %arg4[%c0_62, %c0_63, %c0_64] : memref<2x64x32xbf16, #tpu.memory_space<vmem>>, vector<1x64x32xbf16>
    %171 = vector.shape_cast %170 : vector<1x64x32xbf16> to vector<64x32xbf16>
    %cst_65 = arith.constant dense<0.000000e+00> : vector<16x32xf32>
    %172 = tpu.matmul %169, %171, %cst_65 {dimension_numbers = #tpu.dot_dimension_numbers<[1], [0], [0], [1], [0, 0, 1, 1], [], []>} : vector<16x64xbf16>, vector<64x32xbf16>, vector<16x32xf32> -> vector<16x32xf32>
    %c0_66 = arith.constant 0 : index
    %c3 = arith.constant 3 : index
    %c0_67 = arith.constant 0 : index
    %173 = vector.load %arg2[%c0_66, %c3, %c0_67] : memref<3x8x128xf32, #tpu.memory_space<vmem>>, vector<1x1x32xf32>
    %174 = vector.shape_cast %173 : vector<1x1x32xf32> to vector<1x32xf32>
    %175 = vector.broadcast %174 : vector<1x32xf32> to vector<16x32xf32>
    %176 = arith.addf %172, %175 : vector<16x32xf32>
    %177 = arith.addf %147, %176 : vector<16x32xf32>
    %c0_68 = arith.constant 0 : index
    %c6 = arith.constant 6 : index
    %c0_69 = arith.constant 0 : index
    %178 = vector.load %arg2[%c0_68, %c6, %c0_69] : memref<3x8x128xf32, #tpu.memory_space<vmem>>, vector<1x1x32xf32>
    %179 = vector.shape_cast %178 : vector<1x1x32xf32> to vector<1x32xf32>
    %c0_70 = arith.constant 0 : index
    %c7 = arith.constant 7 : index
    %c0_71 = arith.constant 0 : index
    %180 = vector.load %arg2[%c0_70, %c7, %c0_71] : memref<3x8x128xf32, #tpu.memory_space<vmem>>, vector<1x1x32xf32>
    %181 = vector.shape_cast %180 : vector<1x1x32xf32> to vector<1x32xf32>
    %cst_72 = arith.constant dense<0.000000e+00> : vector<16xf32>
    %182 = vector.multi_reduction <add>, %177, %cst_72 [1] : vector<16x32xf32> to vector<16xf32>
    %183 = vector.shape_cast %182 : vector<16xf32> to vector<16x1xf32>
    %cst_73 = arith.constant 3.200000e+01 : f32
    %184 = vector.broadcast %cst_73 : f32 to vector<16x1xf32>
    %185 = arith.divf %183, %184 : vector<16x1xf32>
    %186 = vector.broadcast %185 : vector<16x1xf32> to vector<16x32xf32>
    %187 = arith.subf %177, %186 : vector<16x32xf32>
    %188 = arith.mulf %187, %187 : vector<16x32xf32>
    %cst_74 = arith.constant dense<0.000000e+00> : vector<16xf32>
    %189 = vector.multi_reduction <add>, %188, %cst_74 [1] : vector<16x32xf32> to vector<16xf32>
    %190 = vector.shape_cast %189 : vector<16xf32> to vector<16x1xf32>
    %cst_75 = arith.constant 3.200000e+01 : f32
    %191 = vector.broadcast %cst_75 : f32 to vector<16x1xf32>
    %192 = arith.divf %190, %191 : vector<16x1xf32>
    %193 = vector.broadcast %185 : vector<16x1xf32> to vector<16x32xf32>
    %194 = arith.subf %177, %193 : vector<16x32xf32>
    %cst_76 = arith.constant 9.99999996E-13 : f32
    %195 = vector.broadcast %cst_76 : f32 to vector<16x1xf32>
    %196 = arith.addf %192, %195 : vector<16x1xf32>
    %197 = math.rsqrt %196 : vector<16x1xf32>
    %198 = vector.broadcast %197 : vector<16x1xf32> to vector<16x32xf32>
    %199 = arith.mulf %194, %198 : vector<16x32xf32>
    %200 = vector.broadcast %179 : vector<1x32xf32> to vector<16x32xf32>
    %201 = arith.mulf %199, %200 : vector<16x32xf32>
    %202 = vector.broadcast %181 : vector<1x32xf32> to vector<16x32xf32>
    %203 = arith.addf %201, %202 : vector<16x32xf32>
    %204 = arith.truncf %203 : vector<16x32xf32> to vector<16x32xbf16>
    %c1_77 = arith.constant 1 : index
    %c0_78 = arith.constant 0 : index
    %c0_79 = arith.constant 0 : index
    %205 = vector.load %arg3[%c1_77, %c0_78, %c0_79] : memref<2x32x192xbf16, #tpu.memory_space<vmem>>, vector<1x32x96xbf16>
    %206 = vector.shape_cast %205 : vector<1x32x96xbf16> to vector<32x96xbf16>
    %cst_80 = arith.constant dense<0.000000e+00> : vector<16x96xf32>
    %207 = tpu.matmul %204, %206, %cst_80 {dimension_numbers = #tpu.dot_dimension_numbers<[1], [0], [0], [1], [0, 0, 1, 1], [], []>} : vector<16x32xbf16>, vector<32x96xbf16>, vector<16x96xf32> -> vector<16x96xf32>
    %c1_81 = arith.constant 1 : index
    %c0_82 = arith.constant 0 : index
    %c0_83 = arith.constant 0 : index
    %208 = vector.load %arg2[%c1_81, %c0_82, %c0_83] : memref<3x8x128xf32, #tpu.memory_space<vmem>>, vector<1x1x96xf32>
    %209 = vector.shape_cast %208 : vector<1x1x96xf32> to vector<1x96xf32>
    %210 = vector.broadcast %209 : vector<1x96xf32> to vector<16x96xf32>
    %211 = arith.addf %207, %210 : vector<16x96xf32>
    %212 = vector.extract_strided_slice %211 {offsets = [0, 0], sizes = [16, 32], strides = [1, 1]} : vector<16x96xf32> to vector<16x32xf32>
    %213 = vector.extract_strided_slice %211 {offsets = [0, 32], sizes = [16, 32], strides = [1, 1]} : vector<16x96xf32> to vector<16x32xf32>
    %214 = arith.truncf %213 : vector<16x32xf32> to vector<16x32xbf16>
    %215 = vector.extract_strided_slice %211 {offsets = [0, 64], sizes = [16, 32], strides = [1, 1]} : vector<16x96xf32> to vector<16x32xf32>
    %216 = arith.truncf %215 : vector<16x32xf32> to vector<16x32xbf16>
    %217 = vector.shape_cast %212 : vector<16x32xf32> to vector<2x8x32xf32>
    %218 = vector.extract_strided_slice %217 {offsets = [0, 0, 0], sizes = [2, 1, 32], strides = [1, 1, 1]} : vector<2x8x32xf32> to vector<2x1x32xf32>
    %219 = vector.shape_cast %218 : vector<2x1x32xf32> to vector<2x32xf32>
    %220 = vector.shape_cast %203 : vector<16x32xf32> to vector<2x8x32xf32>
    %221 = vector.extract_strided_slice %220 {offsets = [0, 0, 0], sizes = [2, 1, 32], strides = [1, 1, 1]} : vector<2x8x32xf32> to vector<2x1x32xf32>
    %222 = vector.shape_cast %221 : vector<2x1x32xf32> to vector<2x32xf32>
    %223 = vector.shape_cast %0 : vector<16x16xf32> to vector<2x8x16xf32>
    %224 = vector.extract_strided_slice %223 {offsets = [0, 0, 0], sizes = [2, 1, 16], strides = [1, 1, 1]} : vector<2x8x16xf32> to vector<2x1x16xf32>
    %225 = vector.shape_cast %224 : vector<2x1x16xf32> to vector<2x16xf32>
    %226 = arith.truncf %219 : vector<2x32xf32> to vector<2x32xbf16>
    %227 = vector.extract_strided_slice %226 {offsets = [0, 0], sizes = [2, 8], strides = [1, 1]} : vector<2x32xbf16> to vector<2x8xbf16>
    %228 = vector.extract_strided_slice %214 {offsets = [0, 0], sizes = [16, 8], strides = [1, 1]} : vector<16x32xbf16> to vector<16x8xbf16>
    "tpu.trace_start"() <{level = 10 : i32, message = "qd,kd->qk"}> : () -> ()
    %cst_84 = arith.constant dense<0.000000e+00> : vector<2x16xf32>
    %229 = tpu.matmul %227, %228, %cst_84 {dimension_numbers = #tpu.dot_dimension_numbers<[1], [1], [0], [0], [0, 0, 1, 0], [], []>} : vector<2x8xbf16>, vector<16x8xbf16>, vector<2x16xf32> -> vector<2x16xf32>
    "tpu.trace_stop"() : () -> ()
    %230 = arith.addf %229, %225 : vector<2x16xf32>
    %cst_85 = arith.constant dense<0xFF800000> : vector<2xf32>
    %231 = vector.multi_reduction <maximumf>, %230, %cst_85 [1] : vector<2x16xf32> to vector<2xf32>
    %232 = vector.shape_cast %231 : vector<2xf32> to vector<2x1xf32>
    %233 = vector.broadcast %232 : vector<2x1xf32> to vector<2x16xf32>
    %234 = arith.subf %230, %233 : vector<2x16xf32>
    %235 = math.exp %234 : vector<2x16xf32>
    %cst_86 = arith.constant dense<0.000000e+00> : vector<2xf32>
    %236 = vector.multi_reduction <add>, %235, %cst_86 [1] : vector<2x16xf32> to vector<2xf32>
    %237 = vector.shape_cast %236 : vector<2xf32> to vector<2x1xf32>
    %238 = tpu.reciprocal %237 {approx = true} : vector<2x1xf32> -> vector<2x1xf32>
    %239 = vector.broadcast %238 : vector<2x1xf32> to vector<2x16xf32>
    %240 = arith.mulf %235, %239 : vector<2x16xf32>
    %241 = arith.truncf %240 : vector<2x16xf32> to vector<2x16xbf16>
    %242 = vector.extract_strided_slice %216 {offsets = [0, 0], sizes = [16, 8], strides = [1, 1]} : vector<16x32xbf16> to vector<16x8xbf16>
    %cst_87 = arith.constant dense<0.000000e+00> : vector<2x8xf32>
    %243 = tpu.matmul %241, %242, %cst_87 {dimension_numbers = #tpu.dot_dimension_numbers<[1], [0], [0], [1], [0, 0, 1, 1], [], []>} : vector<2x16xbf16>, vector<16x8xbf16>, vector<2x8xf32> -> vector<2x8xf32>
    %244 = vector.extract_strided_slice %226 {offsets = [0, 8], sizes = [2, 8], strides = [1, 1]} : vector<2x32xbf16> to vector<2x8xbf16>
    %245 = vector.extract_strided_slice %214 {offsets = [0, 8], sizes = [16, 8], strides = [1, 1]} : vector<16x32xbf16> to vector<16x8xbf16>
    "tpu.trace_start"() <{level = 10 : i32, message = "qd,kd->qk"}> : () -> ()
    %cst_88 = arith.constant dense<0.000000e+00> : vector<2x16xf32>
    %246 = tpu.matmul %244, %245, %cst_88 {dimension_numbers = #tpu.dot_dimension_numbers<[1], [1], [0], [0], [0, 0, 1, 0], [], []>} : vector<2x8xbf16>, vector<16x8xbf16>, vector<2x16xf32> -> vector<2x16xf32>
    "tpu.trace_stop"() : () -> ()
    %247 = arith.addf %246, %225 : vector<2x16xf32>
    %cst_89 = arith.constant dense<0xFF800000> : vector<2xf32>
    %248 = vector.multi_reduction <maximumf>, %247, %cst_89 [1] : vector<2x16xf32> to vector<2xf32>
    %249 = vector.shape_cast %248 : vector<2xf32> to vector<2x1xf32>
    %250 = vector.broadcast %249 : vector<2x1xf32> to vector<2x16xf32>
    %251 = arith.subf %247, %250 : vector<2x16xf32>
    %252 = math.exp %251 : vector<2x16xf32>
    %cst_90 = arith.constant dense<0.000000e+00> : vector<2xf32>
    %253 = vector.multi_reduction <add>, %252, %cst_90 [1] : vector<2x16xf32> to vector<2xf32>
    %254 = vector.shape_cast %253 : vector<2xf32> to vector<2x1xf32>
    %255 = tpu.reciprocal %254 {approx = true} : vector<2x1xf32> -> vector<2x1xf32>
    %256 = vector.broadcast %255 : vector<2x1xf32> to vector<2x16xf32>
    %257 = arith.mulf %252, %256 : vector<2x16xf32>
    %258 = arith.truncf %257 : vector<2x16xf32> to vector<2x16xbf16>
    %259 = vector.extract_strided_slice %216 {offsets = [0, 8], sizes = [16, 8], strides = [1, 1]} : vector<16x32xbf16> to vector<16x8xbf16>
    %cst_91 = arith.constant dense<0.000000e+00> : vector<2x8xf32>
    %260 = tpu.matmul %258, %259, %cst_91 {dimension_numbers = #tpu.dot_dimension_numbers<[1], [0], [0], [1], [0, 0, 1, 1], [], []>} : vector<2x16xbf16>, vector<16x8xbf16>, vector<2x8xf32> -> vector<2x8xf32>
    %261 = vector.extract_strided_slice %226 {offsets = [0, 16], sizes = [2, 8], strides = [1, 1]} : vector<2x32xbf16> to vector<2x8xbf16>
    %262 = vector.extract_strided_slice %214 {offsets = [0, 16], sizes = [16, 8], strides = [1, 1]} : vector<16x32xbf16> to vector<16x8xbf16>
    "tpu.trace_start"() <{level = 10 : i32, message = "qd,kd->qk"}> : () -> ()
    %cst_92 = arith.constant dense<0.000000e+00> : vector<2x16xf32>
    %263 = tpu.matmul %261, %262, %cst_92 {dimension_numbers = #tpu.dot_dimension_numbers<[1], [1], [0], [0], [0, 0, 1, 0], [], []>} : vector<2x8xbf16>, vector<16x8xbf16>, vector<2x16xf32> -> vector<2x16xf32>
    "tpu.trace_stop"() : () -> ()
    %264 = arith.addf %263, %225 : vector<2x16xf32>
    %cst_93 = arith.constant dense<0xFF800000> : vector<2xf32>
    %265 = vector.multi_reduction <maximumf>, %264, %cst_93 [1] : vector<2x16xf32> to vector<2xf32>
    %266 = vector.shape_cast %265 : vector<2xf32> to vector<2x1xf32>
    %267 = vector.broadcast %266 : vector<2x1xf32> to vector<2x16xf32>
    %268 = arith.subf %264, %267 : vector<2x16xf32>
    %269 = math.exp %268 : vector<2x16xf32>
    %cst_94 = arith.constant dense<0.000000e+00> : vector<2xf32>
    %270 = vector.multi_reduction <add>, %269, %cst_94 [1] : vector<2x16xf32> to vector<2xf32>
    %271 = vector.shape_cast %270 : vector<2xf32> to vector<2x1xf32>
    %272 = tpu.reciprocal %271 {approx = true} : vector<2x1xf32> -> vector<2x1xf32>
    %273 = vector.broadcast %272 : vector<2x1xf32> to vector<2x16xf32>
    %274 = arith.mulf %269, %273 : vector<2x16xf32>
    %275 = arith.truncf %274 : vector<2x16xf32> to vector<2x16xbf16>
    %276 = vector.extract_strided_slice %216 {offsets = [0, 16], sizes = [16, 8], strides = [1, 1]} : vector<16x32xbf16> to vector<16x8xbf16>
    %cst_95 = arith.constant dense<0.000000e+00> : vector<2x8xf32>
    %277 = tpu.matmul %275, %276, %cst_95 {dimension_numbers = #tpu.dot_dimension_numbers<[1], [0], [0], [1], [0, 0, 1, 1], [], []>} : vector<2x16xbf16>, vector<16x8xbf16>, vector<2x8xf32> -> vector<2x8xf32>
    %278 = vector.extract_strided_slice %226 {offsets = [0, 24], sizes = [2, 8], strides = [1, 1]} : vector<2x32xbf16> to vector<2x8xbf16>
    %279 = vector.extract_strided_slice %214 {offsets = [0, 24], sizes = [16, 8], strides = [1, 1]} : vector<16x32xbf16> to vector<16x8xbf16>
    "tpu.trace_start"() <{level = 10 : i32, message = "qd,kd->qk"}> : () -> ()
    %cst_96 = arith.constant dense<0.000000e+00> : vector<2x16xf32>
    %280 = tpu.matmul %278, %279, %cst_96 {dimension_numbers = #tpu.dot_dimension_numbers<[1], [1], [0], [0], [0, 0, 1, 0], [], []>} : vector<2x8xbf16>, vector<16x8xbf16>, vector<2x16xf32> -> vector<2x16xf32>
    "tpu.trace_stop"() : () -> ()
    %281 = arith.addf %280, %225 : vector<2x16xf32>
    %cst_97 = arith.constant dense<0xFF800000> : vector<2xf32>
    %282 = vector.multi_reduction <maximumf>, %281, %cst_97 [1] : vector<2x16xf32> to vector<2xf32>
    %283 = vector.shape_cast %282 : vector<2xf32> to vector<2x1xf32>
    %284 = vector.broadcast %283 : vector<2x1xf32> to vector<2x16xf32>
    %285 = arith.subf %281, %284 : vector<2x16xf32>
    %286 = math.exp %285 : vector<2x16xf32>
    %cst_98 = arith.constant dense<0.000000e+00> : vector<2xf32>
    %287 = vector.multi_reduction <add>, %286, %cst_98 [1] : vector<2x16xf32> to vector<2xf32>
    %288 = vector.shape_cast %287 : vector<2xf32> to vector<2x1xf32>
    %289 = tpu.reciprocal %288 {approx = true} : vector<2x1xf32> -> vector<2x1xf32>
    %290 = vector.broadcast %289 : vector<2x1xf32> to vector<2x16xf32>
    %291 = arith.mulf %286, %290 : vector<2x16xf32>
    %292 = arith.truncf %291 : vector<2x16xf32> to vector<2x16xbf16>
    %293 = vector.extract_strided_slice %216 {offsets = [0, 24], sizes = [16, 8], strides = [1, 1]} : vector<16x32xbf16> to vector<16x8xbf16>
    %cst_99 = arith.constant dense<0.000000e+00> : vector<2x8xf32>
    %294 = tpu.matmul %292, %293, %cst_99 {dimension_numbers = #tpu.dot_dimension_numbers<[1], [0], [0], [1], [0, 0, 1, 1], [], []>} : vector<2x16xbf16>, vector<16x8xbf16>, vector<2x8xf32> -> vector<2x8xf32>
    %295 = tpu.concatenate %243, %260, %277, %294 in 1 : vector<2x8xf32>, vector<2x8xf32>, vector<2x8xf32>, vector<2x8xf32> -> vector<2x32xf32>
    %296 = arith.truncf %295 : vector<2x32xf32> to vector<2x32xbf16>
    %c1_100 = arith.constant 1 : index
    %c0_101 = arith.constant 0 : index
    %c96_102 = arith.constant 96 : index
    %297 = vector.load %arg3[%c1_100, %c0_101, %c96_102] : memref<2x32x192xbf16, #tpu.memory_space<vmem>>, vector<1x32x32xbf16>
    %298 = vector.shape_cast %297 : vector<1x32x32xbf16> to vector<32x32xbf16>
    %cst_103 = arith.constant dense<0.000000e+00> : vector<2x32xf32>
    %299 = tpu.matmul %296, %298, %cst_103 {dimension_numbers = #tpu.dot_dimension_numbers<[1], [0], [0], [1], [0, 0, 1, 1], [], []>} : vector<2x32xbf16>, vector<32x32xbf16>, vector<2x32xf32> -> vector<2x32xf32>
    %c1_104 = arith.constant 1 : index
    %c1_105 = arith.constant 1 : index
    %c0_106 = arith.constant 0 : index
    %300 = vector.load %arg2[%c1_104, %c1_105, %c0_106] : memref<3x8x128xf32, #tpu.memory_space<vmem>>, vector<1x1x32xf32>
    %301 = vector.shape_cast %300 : vector<1x1x32xf32> to vector<1x32xf32>
    %302 = vector.broadcast %301 : vector<1x32xf32> to vector<2x32xf32>
    %303 = arith.addf %299, %302 : vector<2x32xf32>
    %304 = arith.addf %222, %303 : vector<2x32xf32>
    %c1_107 = arith.constant 1 : index
    %c4_108 = arith.constant 4 : index
    %c0_109 = arith.constant 0 : index
    %305 = vector.load %arg2[%c1_107, %c4_108, %c0_109] : memref<3x8x128xf32, #tpu.memory_space<vmem>>, vector<1x1x32xf32>
    %306 = vector.shape_cast %305 : vector<1x1x32xf32> to vector<1x32xf32>
    %c1_110 = arith.constant 1 : index
    %c5_111 = arith.constant 5 : index
    %c0_112 = arith.constant 0 : index
    %307 = vector.load %arg2[%c1_110, %c5_111, %c0_112] : memref<3x8x128xf32, #tpu.memory_space<vmem>>, vector<1x1x32xf32>
    %308 = vector.shape_cast %307 : vector<1x1x32xf32> to vector<1x32xf32>
    %cst_113 = arith.constant dense<0.000000e+00> : vector<2xf32>
    %309 = vector.multi_reduction <add>, %304, %cst_113 [1] : vector<2x32xf32> to vector<2xf32>
    %310 = vector.shape_cast %309 : vector<2xf32> to vector<2x1xf32>
    %cst_114 = arith.constant 3.200000e+01 : f32
    %311 = vector.broadcast %cst_114 : f32 to vector<2x1xf32>
    %312 = arith.divf %310, %311 : vector<2x1xf32>
    %313 = vector.broadcast %312 : vector<2x1xf32> to vector<2x32xf32>
    %314 = arith.subf %304, %313 : vector<2x32xf32>
    %315 = arith.mulf %314, %314 : vector<2x32xf32>
    %cst_115 = arith.constant dense<0.000000e+00> : vector<2xf32>
    %316 = vector.multi_reduction <add>, %315, %cst_115 [1] : vector<2x32xf32> to vector<2xf32>
    %317 = vector.shape_cast %316 : vector<2xf32> to vector<2x1xf32>
    %cst_116 = arith.constant 3.200000e+01 : f32
    %318 = vector.broadcast %cst_116 : f32 to vector<2x1xf32>
    %319 = arith.divf %317, %318 : vector<2x1xf32>
    %320 = vector.broadcast %312 : vector<2x1xf32> to vector<2x32xf32>
    %321 = arith.subf %304, %320 : vector<2x32xf32>
    %cst_117 = arith.constant 9.99999996E-13 : f32
    %322 = vector.broadcast %cst_117 : f32 to vector<2x1xf32>
    %323 = arith.addf %319, %322 : vector<2x1xf32>
    %324 = math.rsqrt %323 : vector<2x1xf32>
    %325 = vector.broadcast %324 : vector<2x1xf32> to vector<2x32xf32>
    %326 = arith.mulf %321, %325 : vector<2x32xf32>
    %327 = vector.broadcast %306 : vector<1x32xf32> to vector<2x32xf32>
    %328 = arith.mulf %326, %327 : vector<2x32xf32>
    %329 = vector.broadcast %308 : vector<1x32xf32> to vector<2x32xf32>
    %330 = arith.addf %328, %329 : vector<2x32xf32>
    %331 = arith.truncf %330 : vector<2x32xf32> to vector<2x32xbf16>
    %c1_118 = arith.constant 1 : index
    %c0_119 = arith.constant 0 : index
    %c128_120 = arith.constant 128 : index
    %332 = vector.load %arg3[%c1_118, %c0_119, %c128_120] : memref<2x32x192xbf16, #tpu.memory_space<vmem>>, vector<1x32x64xbf16>
    %333 = vector.shape_cast %332 : vector<1x32x64xbf16> to vector<32x64xbf16>
    %cst_121 = arith.constant dense<0.000000e+00> : vector<2x64xf32>
    %334 = tpu.matmul %331, %333, %cst_121 {dimension_numbers = #tpu.dot_dimension_numbers<[1], [0], [0], [1], [0, 0, 1, 1], [], []>} : vector<2x32xbf16>, vector<32x64xbf16>, vector<2x64xf32> -> vector<2x64xf32>
    %c1_122 = arith.constant 1 : index
    %c2_123 = arith.constant 2 : index
    %c0_124 = arith.constant 0 : index
    %335 = vector.load %arg2[%c1_122, %c2_123, %c0_124] : memref<3x8x128xf32, #tpu.memory_space<vmem>>, vector<1x1x64xf32>
    %336 = vector.shape_cast %335 : vector<1x1x64xf32> to vector<1x64xf32>
    %337 = vector.broadcast %336 : vector<1x64xf32> to vector<2x64xf32>
    %338 = arith.addf %334, %337 : vector<2x64xf32>
    %cst_125 = arith.constant 5.000000e-01 : f32
    %339 = vector.broadcast %cst_125 : f32 to vector<2x64xf32>
    %340 = arith.mulf %339, %338 : vector<2x64xf32>
    %cst_126 = arith.constant 4.471500e-02 : f32
    %341 = vector.broadcast %cst_126 : f32 to vector<2x64xf32>
    %342 = arith.mulf %341, %338 : vector<2x64xf32>
    %343 = arith.mulf %342, %338 : vector<2x64xf32>
    %344 = arith.mulf %343, %338 : vector<2x64xf32>
    %345 = arith.addf %338, %344 : vector<2x64xf32>
    %cst_127 = arith.constant 0.797884583 : f32
    %346 = vector.broadcast %cst_127 : f32 to vector<2x64xf32>
    %347 = arith.mulf %346, %345 : vector<2x64xf32>
    %348 = math.tanh %347 : vector<2x64xf32>
    %cst_128 = arith.constant 1.000000e+00 : f32
    %349 = vector.broadcast %cst_128 : f32 to vector<2x64xf32>
    %350 = arith.addf %349, %348 : vector<2x64xf32>
    %351 = arith.mulf %340, %350 : vector<2x64xf32>
    %352 = arith.truncf %351 : vector<2x64xf32> to vector<2x64xbf16>
    %c1_129 = arith.constant 1 : index
    %c0_130 = arith.constant 0 : index
    %c0_131 = arith.constant 0 : index
    %353 = vector.load %arg4[%c1_129, %c0_130, %c0_131] : memref<2x64x32xbf16, #tpu.memory_space<vmem>>, vector<1x64x32xbf16>
    %354 = vector.shape_cast %353 : vector<1x64x32xbf16> to vector<64x32xbf16>
    %cst_132 = arith.constant dense<0.000000e+00> : vector<2x32xf32>
    %355 = tpu.matmul %352, %354, %cst_132 {dimension_numbers = #tpu.dot_dimension_numbers<[1], [0], [0], [1], [0, 0, 1, 1], [], []>} : vector<2x64xbf16>, vector<64x32xbf16>, vector<2x32xf32> -> vector<2x32xf32>
    %c1_133 = arith.constant 1 : index
    %c3_134 = arith.constant 3 : index
    %c0_135 = arith.constant 0 : index
    %356 = vector.load %arg2[%c1_133, %c3_134, %c0_135] : memref<3x8x128xf32, #tpu.memory_space<vmem>>, vector<1x1x32xf32>
    %357 = vector.shape_cast %356 : vector<1x1x32xf32> to vector<1x32xf32>
    %358 = vector.broadcast %357 : vector<1x32xf32> to vector<2x32xf32>
    %359 = arith.addf %355, %358 : vector<2x32xf32>
    %360 = arith.addf %330, %359 : vector<2x32xf32>
    %c1_136 = arith.constant 1 : index
    %c6_137 = arith.constant 6 : index
    %c0_138 = arith.constant 0 : index
    %361 = vector.load %arg2[%c1_136, %c6_137, %c0_138] : memref<3x8x128xf32, #tpu.memory_space<vmem>>, vector<1x1x32xf32>
    %362 = vector.shape_cast %361 : vector<1x1x32xf32> to vector<1x32xf32>
    %c1_139 = arith.constant 1 : index
    %c7_140 = arith.constant 7 : index
    %c0_141 = arith.constant 0 : index
    %363 = vector.load %arg2[%c1_139, %c7_140, %c0_141] : memref<3x8x128xf32, #tpu.memory_space<vmem>>, vector<1x1x32xf32>
    %364 = vector.shape_cast %363 : vector<1x1x32xf32> to vector<1x32xf32>
    %cst_142 = arith.constant dense<0.000000e+00> : vector<2xf32>
    %365 = vector.multi_reduction <add>, %360, %cst_142 [1] : vector<2x32xf32> to vector<2xf32>
    %366 = vector.shape_cast %365 : vector<2xf32> to vector<2x1xf32>
    %cst_143 = arith.constant 3.200000e+01 : f32
    %367 = vector.broadcast %cst_143 : f32 to vector<2x1xf32>
    %368 = arith.divf %366, %367 : vector<2x1xf32>
    %369 = vector.broadcast %368 : vector<2x1xf32> to vector<2x32xf32>
    %370 = arith.subf %360, %369 : vector<2x32xf32>
    %371 = arith.mulf %370, %370 : vector<2x32xf32>
    %cst_144 = arith.constant dense<0.000000e+00> : vector<2xf32>
    %372 = vector.multi_reduction <add>, %371, %cst_144 [1] : vector<2x32xf32> to vector<2xf32>
    %373 = vector.shape_cast %372 : vector<2xf32> to vector<2x1xf32>
    %cst_145 = arith.constant 3.200000e+01 : f32
    %374 = vector.broadcast %cst_145 : f32 to vector<2x1xf32>
    %375 = arith.divf %373, %374 : vector<2x1xf32>
    %376 = vector.broadcast %368 : vector<2x1xf32> to vector<2x32xf32>
    %377 = arith.subf %360, %376 : vector<2x32xf32>
    %cst_146 = arith.constant 9.99999996E-13 : f32
    %378 = vector.broadcast %cst_146 : f32 to vector<2x1xf32>
    %379 = arith.addf %375, %378 : vector<2x1xf32>
    %380 = math.rsqrt %379 : vector<2x1xf32>
    %381 = vector.broadcast %380 : vector<2x1xf32> to vector<2x32xf32>
    %382 = arith.mulf %377, %381 : vector<2x32xf32>
    %383 = vector.broadcast %362 : vector<1x32xf32> to vector<2x32xf32>
    %384 = arith.mulf %382, %383 : vector<2x32xf32>
    %385 = vector.broadcast %364 : vector<1x32xf32> to vector<2x32xf32>
    %386 = arith.addf %384, %385 : vector<2x32xf32>
    %387 = arith.truncf %386 : vector<2x32xf32> to vector<2x32xbf16>
    %c0_147 = arith.constant 0 : index
    %c0_148 = arith.constant 0 : index
    %388 = vector.load %arg5[%c0_147, %c0_148] : memref<32x128xbf16, #tpu.memory_space<vmem>>, vector<32x128xbf16>
    %cst_149 = arith.constant dense<0.000000e+00> : vector<2x128xf32>
    %389 = tpu.matmul %387, %388, %cst_149 {dimension_numbers = #tpu.dot_dimension_numbers<[1], [0], [0], [1], [0, 0, 1, 1], [], []>} : vector<2x32xbf16>, vector<32x128xbf16>, vector<2x128xf32> -> vector<2x128xf32>
    %390 = vector.broadcast %6 : vector<1x128xf32> to vector<2x128xf32>
    %391 = arith.addf %389, %390 : vector<2x128xf32>
    %c0_150 = arith.constant 0 : index
    %c0_151 = arith.constant 0 : index
    %392 = vector.load %arg6[%c0_150, %c0_151] : memref<2x128xf32, #tpu.memory_space<vmem>>, vector<2x128xf32>
    tpu.vector_store %arg6[%c0_150, %c0_151], %391 {strides = array<i32>} : memref<2x128xf32, #tpu.memory_space<vmem>>, vector<2x128xf32>,
    return
  }
}

</mosaic_0001>

<bundles_post_ra>
// kernel: sentiment_classifier_forward.1
= control target key start
LH: loop header
LB: loop body
LE: loop exit
PB: predicated region body
PF: predicated region fallthrough
CT: control target
= control target key end

     0   :  { %vm33_vm0 = vcmask 261120   ;;  %s2042_s0 = inlined_call_operand.vmem [shape: f32[16,32], index: 0, kind: input, shape index: {}]   ;;  %s2043_s1 = inlined_call_operand.vmem [shape: f32[16,16], index: 1, kind: input, shape index: {}]   ;;  %s2044_s2 = inlined_call_operand.vmem [shape: f32[3,8,128], index: 2, kind: input, shape index: {}]   ;;  %s2045_s3 = inlined_call_operand.vmem [shape: bf16[2,32,192], index: 3, kind: input, shape index: {}]   ;;  %s2046_s4 = inlined_call_operand.vmem [shape: bf16[2,64,32], index: 4, kind: input, shape index: {}]   ;;  %s2047_s5 = inlined_call_operand.vmem [shape: bf16[32,128], index: 5, kind: input, shape index: {}]   ;;  %s2048_s6 = inlined_call_operand.hbm [shape: f32[2,128], index: 6, kind: output, shape index: {}]  }
   0x1   :  { %v31_v0 = vld [vmem:[%s2042_s0] sm:$0xff]  ;;  %v32_v2 = vld [vmem:[%s2042_s0 + $0x8] sm:$0xff] }
   0x2   :  { %v34_v1 = vsel %vm33_vm0, %v31_v0, 0.0  ;;  %v37_v3 = vsel %vm33_vm0, %v32_v2, 0.0 }
   0x3   :  { %35 = vadd.xlane.f32.xlu0 %v34_v1 }
   0x4   :  { %11 = vsyncpa [#allocation3], 0  ;;  %v1610_v4 = vmov 32.0   ;;  %v1302_v21 = vld [vmem:[%s2045_s3 + $0x10] sm:$0xf]  ;;  %s1611_s14 = smov 72  }
   0x5   :  { %1512 = vrcp.f32 %v1610_v4  ;;  %v1440_v22 = vld [vmem:[%s2045_s3 + $0x14] sm:$0xf0]  ;;  %v1298_v24 = vld [vmem:[%s2045_s3] sm:$0xf]  ;;  %v1439_v25 = vld [vmem:[%s2045_s3 + $0x4] sm:$0xf0] }
   0x6   :  { %v1303_v23 = vor.u32 %v1440_v22, %v1302_v21  ;;  %v1299_v27 = vor.u32 %v1439_v25, %v1298_v24  ;;  %v1493_v46 = vld [vmem:[%s2044_s2 + $0x10] ss:$0 sm:$0xff]  ;;  %v1494_v51 = vld [vmem:[%s2044_s2 + $0x11] ss:$0 sm:$0xff]  ;;  %v1495_v57 = vld [vmem:[%s2044_s2] ss:$0 sm:$0xff] }
   0x7   :  { %s1612_s15 = smov 120   ;;  %s1613_s16 = smov 96   ;;  %vm136_vm8 = vcmask 64512   ;;  %vm157_vm9 = vcmask 130048   ;;  %vm430_vm10 = vcmask 195584  }
   0x8   :  { %119 = vmatpush.bf16.msra.mxu0 %v1303_v23  ;;  %s1614_s17 = smov 88   ;;  %s1615_s18 = smov 104  }
   0x9   :  { %s1616_s19 = smov 80   ;;  %s1617_s20 = smov 112  }
   0xa   :  { %s1619_s0 = smov 56   ;;  %s1620_s25 = smov 40  }
   0xb   :  { %38 = vadd.xlane.f32.xlu0 %v37_v3  ;;  %v1513_v5 = vpop.eup %1512  ;;  %s1621_s26 = smov 48   ;;  %s1622_s7 = smov 32  }
   0xc   :  { %v41_v6 = vmul.f32 32.0, %v1513_v5  ;;  %vm45_vm1 = vweird.f32 %v1513_v5  ;;  %120 = vmatpush.bf16.msra.mxu0 %v1299_v27  ;;  %s1623_s8 = smov 8   ;;  %s1624_s9 = smov 24  }
   0xd   :  { %s1625_s10 = smov 16   ;;  %s1626_s11 = smov [#allocation2]  }
   0xe   :  { %v42_v7 = vsub.f32 1.0, %v41_v6  ;;  %s1282_s12 = sshll.u32 %s1626_s11, 4  ;;  %s1284_s22 = sshll.u32 %s2048_s6, 4  ;;  %s1283_s12 = int_to_ptr.vmem [resolvable:$true] %s1282_s12  ;;  %s1285_s22 = int_to_ptr.hbm [resolvable:$true] %s1284_s22 }
  0x10   :  { %v43_v8 = vmul.f32 %v1513_v5, %v42_v7 }
  0x12   :  { %v44_v9 = vadd.f32 %v1513_v5, %v43_v8 }
  0x14   :  { %v1670_v10 = vsel %vm45_vm1, %v1513_v5, %v44_v9 }
  0x76   :  { %v36_v11 = vpop.xlane.xlu0 %35 }
  0x77   :  { %v47_v12 = vmul.f32 %v1670_v10, %v36_v11 }
  0x79   :  { %v49_v13 = vsub.f32 %v31_v0, %v47_v12 }
  0x7b   :  { %v51_v14 = vmul.f32 %v49_v13, %v49_v13 }
  0x7d   :  { %v53_v15 = vsel %vm33_vm0, %v51_v14, 0.0  ;;  %v1734_v14 = vld [vmem:[%s2043_s1] sm:$0xff] }
  0x7e   :  { %54 = vadd.xlane.f32.xlu1 %v53_v15  ;;  %v39_v16 = vpop.xlane.xlu0 %38 }
  0x7f   :  { %v48_v17 = vmul.f32 %v1670_v10, %v39_v16 }
  0x81   :  { %v50_v18 = vsub.f32 %v32_v2, %v48_v17 }
  0x83   :  { %v52_v19 = vmul.f32 %v50_v18, %v50_v18 }
  0x85   :  { %v56_v20 = vsel %vm33_vm0, %v52_v19, 0.0 }
  0x86   :  { %57 = vadd.xlane.f32.xlu1 %v56_v20 }
  0xf1   :  { %v55_v26 = vpop.xlane.xlu1 %54 }
  0xf2   :  { %v59_v28 = vmul.f32 %v55_v26, %v1670_v10 }
  0xf4   :  { %v61_v29 = vadd.f32 1e-12, %v59_v28 }
  0xf6   :  { %1514 = vrsqrt.f32 %v61_v29  ;;  %vm69_vm3 = vweird.f32 %v61_v29 }
  0xf9   :  { %v58_v30 = vpop.xlane.xlu1 %57 }
  0xfa   :  { %v60_v31 = vmul.f32 %v58_v30, %v1670_v10 }
  0xfc   :  { %v1515_v32 = vpop.eup %1514  ;;  %v62_v33 = vadd.f32 1e-12, %v60_v31 }
  0xfd   :  { %v64_v34 = vmul.f32 %v1515_v32, %v61_v29  ;;  %vm70_vm2 = vweird.f32 %v1515_v32 }
  0xfe   :  { %1516 = vrsqrt.f32 %v62_v33  ;;  %vm71_vm4 = vmor %vm69_vm3, %vm70_vm2  ;;  %vm79_vm6 = vweird.f32 %v62_v33  ;;  %vm616_vm2 = vcmask 523264  }
  0xff   :  { %v65_v35 = vmul.f32 %v1515_v32, %v64_v34 }
 0x101   :  { %v66_v36 = vmul.f32 0.5, %v65_v35 }
 0x103   :  { %v67_v37 = vsub.f32 1.5, %v66_v36 }
 0x104   :  { %v1517_v38 = vpop.eup %1516 }
 0x105   :  { %v68_v39 = vmul.f32 %v1515_v32, %v67_v37  ;;  %v74_v40 = vmul.f32 %v1517_v38, %v62_v33  ;;  %vm80_vm5 = vweird.f32 %v1517_v38 }
 0x106   :  { %vm81_vm7 = vmor %vm79_vm6, %vm80_vm5 }
 0x107   :  { %v75_v41 = vmul.f32 %v1517_v38, %v74_v40  ;;  %v72_v42 = vsel %vm71_vm4, %v1515_v32, %v68_v39 }
 0x108   :  { %v83_v45 = vmul.f32 %v72_v42, %v49_v13 }
 0x109   :  { %v76_v43 = vmul.f32 0.5, %v75_v41 }
 0x10a   :  { %v86_v50 = vmul.f32 %v1493_v46, %v83_v45 }
 0x10b   :  { %v77_v44 = vsub.f32 1.5, %v76_v43 }
 0x10c   :  { %v1696_v53 = vadd.f32 %v1494_v51, %v86_v50 }
 0x10d   :  { %v78_v47 = vmul.f32 %v1517_v38, %v77_v44 }
 0x10f   :  { %v82_v48 = vsel %vm81_vm7, %v1517_v38, %v78_v47 }
 0x110   :  { %v84_v49 = vmul.f32 %v82_v48, %v50_v18  ;;  %v1741_v18 = vld [vmem:[%s2043_s1 + $0x8] sm:$0xff]  ;;  %s1618_s1 = smov 64  }
 0x112   :  { %v87_v52 = vmul.f32 %v1493_v46, %v84_v49 }
 0x114   :  { %v1698_v54 = vadd.f32 %v1494_v51, %v87_v52 }
 0x116   :  { %v91_v55 = vpack.c.bf16 %v1698_v54, %v1696_v53 }
 0x118   :  { %1304 = vmatmul.msk.bf16.vlgmr.msra.gmra.mxu0 %vm33_vm0, %v91_v55 }
 0x195   :  { %v122_v56 = vpop.f32.mrf.mxu0 }
 0x196   :  { %v123_v58 = vadd.f32 %v1495_v57, %v122_v56 }
 0x198   :  { %v127_v60 = vpack.c.bf16 %v123_v58, %v123_v58 }
 0x19a   :  { %v131_v63 = vunpack.c.l.b16 %v127_v60 }
 0x19d   :  { %v124_v59 = vpop.f32.mrf.mxu0 }
 0x19e   :  { %v125_v61 = vadd.f32 %v1495_v57, %v124_v59 }
 0x1a0   :  { %v128_v62 = vpack.c.bf16 %v125_v61, %v125_v61 }
 0x1a2   :  { %v132_v0 = vunpack.c.l.b16 %v128_v62 }
 0x1a4   :  { %v1706_v1 = vpack.c.b16 %v132_v0, %v131_v63 }
 0x1a6   :  { %337 = vrot.lane.b32.xlu1 %v1706_v1, %s1611_s14  ;;  %201 = vrot.lane.b32.xlu0 %v1706_v1, %s1612_s15 }
 0x1a7   :  { %134 = vrot.lane.b32.xlu2 %v1706_v1, %s1613_s16 }
 0x1af   :  { %203 = vrot.lane.b32.xlu2 %v1706_v1, %s1614_s17 }
 0x1b7   :  { %335 = vrot.lane.b32.xlu2 %v1706_v1, %s1615_s18 }
 0x1bf   :  { %270 = vrot.lane.b32.xlu2 %v1706_v1, %s1616_s19 }
 0x1c7   :  { %268 = vrot.lane.b32.xlu2 %v1706_v1, %s1617_s20 }
 0x201   :  { %v135_v2 = vpop.permute.xlu2 %134 }
 0x202   :  { %v141_v3 = vsel %vm136_vm8, %v135_v2, 0 }
 0x203   :  { %150 = vmatpush.bf16.xpose.msra.mxu1 %v141_v3 }
 0x209   :  { %v204_v4 = vpop.permute.xlu2 %203 }
 0x20a   :  { %1305 = vmatmul.msk.bf16.vlgmr.msra.gmra.mxu1 %vm136_vm8, %v1706_v1  ;;  %v209_v5 = vsel %vm136_vm8, %v204_v4, 0 }
 0x20b   :  { %218 = vmatpush.bf16.xpose.msra.mxu3 %v209_v5 }
 0x211   :  { %v336_v6 = vpop.permute.xlu2 %335 }
 0x218   :  { %v338_v7 = vpop.permute.xlu1 %337  ;;  %v202_v8 = vpop.permute.xlu0 %201 }
 0x219   :  { %v271_v9 = vpop.permute.xlu2 %270  ;;  %1307 = vmatmul.msk.bf16.vlgmr.msra.gmra.mxu3 %vm136_vm8, %v202_v8  ;;  %v343_v11 = vsel %vm136_vm8, %v338_v7, 0 }
 0x21a   :  { %v276_v12 = vsel %vm136_vm8, %v271_v9, 0  ;;  %352 = vmatpush.bf16.xpose.msrb.mxu3 %v343_v11 }
 0x21b   :  { %285 = vmatpush.bf16.xpose.msrb.mxu0 %v276_v12 }
 0x221   :  { %v269_v13 = vpop.permute.xlu2 %268 }
 0x222   :  { %1309 = vmatmul.msk.bf16.vlgmr.msrb.gmra.mxu0 %vm136_vm8, %v269_v13 }
 0x229   :  { %1311 = vmatmul.msk.bf16.vlgmr.msrb.gmra.mxu3 %vm136_vm8, %v336_v6 }
 0x287   :  { %v152_v15 = vpop.f32.mrf.mxu1 }
 0x288   :  { %v153_v16 = vadd.f32 %v152_v15, %v1734_v14 }
 0x28a   :  { %v158_v17 = vsel %vm157_vm9, %v153_v16, -inf }
 0x28b   :  { %159 = vmax.xlane.f32.xlu0 %v158_v17 }
 0x28f   :  { %v154_v19 = vpop.f32.mrf.mxu1 }
 0x290   :  { %v155_v20 = vadd.f32 %v154_v19, %v1741_v18 }
 0x292   :  { %v161_v21 = vsel %vm157_vm9, %v155_v20, -inf }
 0x293   :  { %162 = vmax.xlane.f32.xlu2 %v161_v21 }
 0x29c   :  { %v220_v22 = vpop.f32.mrf.mxu3 }
 0x29d   :  { %v221_v23 = vadd.f32 %v220_v22, %v1734_v14 }
 0x29f   :  { %v287_v24 = vpop.f32.mrf.mxu0  ;;  %v225_v25 = vsel %vm157_vm9, %v221_v23, -inf }
 0x2a0   :  { %v288_v26 = vadd.f32 %v287_v24, %v1734_v14  ;;  %226 = vmax.xlane.f32.xlu1 %v225_v25 }
 0x2a2   :  { %v292_v27 = vsel %vm157_vm9, %v288_v26, -inf }
 0x2a3   :  { %293 = vmax.xlane.f32.xlu0 %v292_v27 }
 0x2a4   :  { %v222_v28 = vpop.f32.mrf.mxu3 }
 0x2a5   :  { %v223_v29 = vadd.f32 %v222_v28, %v1741_v18 }
 0x2a7   :  { %v289_v30 = vpop.f32.mrf.mxu0  ;;  %v228_v33 = vsel %vm157_vm9, %v223_v29, -inf }
 0x2a8   :  { %v290_v31 = vadd.f32 %v289_v30, %v1741_v18 }
 0x2aa   :  { %v295_v32 = vsel %vm157_vm9, %v290_v31, -inf }
 0x2ab   :  { %296 = vmax.xlane.f32.xlu2 %v295_v32  ;;  %229 = vmax.xlane.f32.xlu0 %v228_v33 }
 0x2ac   :  { %v354_v34 = vpop.f32.mrf.mxu3 }
 0x2ad   :  { %v355_v35 = vadd.f32 %v354_v34, %v1734_v14 }
 0x2af   :  { %v359_v36 = vsel %vm157_vm9, %v355_v35, -inf }
 0x2b3   :  { %360 = vmax.xlane.f32.xlu2 %v359_v36 }
 0x2b4   :  { %v356_v37 = vpop.f32.mrf.mxu3 }
 0x2b5   :  { %v357_v38 = vadd.f32 %v356_v37, %v1741_v18 }
 0x2b7   :  { %v362_v39 = vsel %vm157_vm9, %v357_v38, -inf }
 0x2b8   :  { %363 = vmax.xlane.f32.xlu1 %v362_v39 }
 0x2cb   :  { %181 = vrot.lane.b32.xlu2 %v1706_v1, %s1618_s1 }
 0x2d1   :  { %248 = vrot.lane.b32.xlu1 %v1706_v1, %s1619_s0 }
 0x2fe   :  { %v160_v40 = vpop.xlane.xlu0 %159 }
 0x2ff   :  { %v164_v41 = vsub.f32 %v153_v16, %v160_v40 }
 0x301   :  { %v166_v42 = vmul.f32 1.442695, %v164_v41 }
 0x303   :  { %1518 = vpow2.f32 %v166_v42 }
 0x306   :  { %v163_v43 = vpop.xlane.xlu2 %162 }
 0x307   :  { %v165_v44 = vsub.f32 %v155_v20, %v163_v43 }
 0x309   :  { %v1761_v45 = vpop.eup %1518  ;;  %v168_v46 = vmul.f32 1.442695, %v165_v44 }
 0x30a   :  { %v170_v47 = vsel %vm157_vm9, %v1761_v45, 0.0 }
 0x30b   :  { %1520 = vpow2.f32 %v168_v46  ;;  %171 = vadd.xlane.f32.xlu1 %v170_v47 }
 0x311   :  { %v1521_v48 = vpop.eup %1520 }
 0x312   :  { %v173_v49 = vsel %vm157_vm9, %v1521_v48, 0.0 }
 0x313   :  { %174 = vadd.xlane.f32.xlu0 %v173_v49  ;;  %v227_v50 = vpop.xlane.xlu1 %226 }
 0x314   :  { %v231_v51 = vsub.f32 %v221_v23, %v227_v50 }
 0x316   :  { %v233_v52 = vmul.f32 1.442695, %v231_v51  ;;  %v294_v55 = vpop.xlane.xlu0 %293 }
 0x317   :  { %v298_v56 = vsub.f32 %v288_v26, %v294_v55  ;;  %v1319_v55 = vld [vmem:[%s2045_s3 + $0x10] sm:$0xf] }
 0x318   :  { %1522 = vpow2.f32 %v233_v52 }
 0x319   :  { %v300_v57 = vmul.f32 1.442695, %v298_v56  ;;  %v1442_v56 = vld [vmem:[%s2045_s3 + $0x14] sm:$0xf0] }
 0x31b   :  { %1524 = vpow2.f32 %v300_v57  ;;  %v1320_v57 = vor.u32 %v1442_v56, %v1319_v55 }
 0x31e   :  { %v1523_v58 = vpop.eup %1522  ;;  %v297_v59 = vpop.xlane.xlu2 %296 }
 0x31f   :  { %v230_v60 = vpop.xlane.xlu0 %229  ;;  %v299_v61 = vsub.f32 %v290_v31, %v297_v59  ;;  %v237_v62 = vsel %vm157_vm9, %v1523_v58, 0.0 }
 0x320   :  { %238 = vadd.xlane.f32.xlu1 %v237_v62  ;;  %v232_v2 = vsub.f32 %v223_v29, %v230_v60 }
 0x321   :  { %v1767_v63 = vpop.eup %1524  ;;  %v302_v0 = vmul.f32 1.442695, %v299_v61 }
 0x322   :  { %v304_v3 = vsel %vm157_vm9, %v1767_v63, 0.0  ;;  %v235_v4 = vmul.f32 1.442695, %v232_v2 }
 0x323   :  { %1526 = vpow2.f32 %v302_v0  ;;  %305 = vadd.xlane.f32.xlu2 %v304_v3 }
 0x324   :  { %1528 = vpow2.f32 %v235_v4 }
 0x326   :  { %v361_v5 = vpop.xlane.xlu2 %360 }
 0x327   :  { %v365_v7 = vsub.f32 %v355_v35, %v361_v5 }
 0x329   :  { %v1771_v6 = vpop.eup %1526  ;;  %v367_v9 = vmul.f32 1.442695, %v365_v7  ;;  %v1441_v7 = vld [vmem:[%s2045_s3 + $0x4] sm:$0xf0] }
 0x32a   :  { %v307_v8 = vsel %vm157_vm9, %v1771_v6, 0.0  ;;  %v1529_v13 = vpop.eup %1528 }
 0x32b   :  { %308 = vadd.xlane.f32.xlu0 %v307_v8  ;;  %v364_v11 = vpop.xlane.xlu1 %363  ;;  %1530 = vpow2.f32 %v367_v9  ;;  %v240_v16 = vsel %vm157_vm9, %v1529_v13, 0.0 }
 0x32c   :  { %v366_v15 = vsub.f32 %v357_v38, %v364_v11 }
 0x32e   :  { %v182_v12 = vpop.permute.xlu2 %181  ;;  %v369_v17 = vmul.f32 1.442695, %v366_v15 }
 0x32f   :  { %194 = vmatpush.bf16.msra.mxu2 %v182_v12 }
 0x330   :  { %1532 = vpow2.f32 %v369_v17 }
 0x331   :  { %v1531_v19 = vpop.eup %1530 }
 0x332   :  { %v371_v20 = vsel %vm157_vm9, %v1531_v19, 0.0 }
 0x333   :  { %241 = vadd.xlane.f32.xlu0 %v240_v16 }
 0x336   :  { %v1533_v21 = vpop.eup %1532 }
 0x337   :  { %v374_v22 = vsel %vm157_vm9, %v1533_v21, 0.0 }
 0x339   :  { %382 = vrot.lane.b32.xlu1 %v1706_v1, %s1620_s25 }
 0x33b   :  { %372 = vadd.xlane.f32.xlu0 %v371_v20 }
 0x341   :  { %452 = vrot.lane.b32.xlu1 %v1320_v57, %s1622_s7 }
 0x343   :  { %375 = vadd.xlane.f32.xlu0 %v374_v22  ;;  %v249_v23 = vpop.permute.xlu1 %248 }
 0x344   :  { %261 = vmatpush.bf16.msrb.mxu2 %v249_v23 }
 0x357   :  { %315 = vrot.lane.b32.xlu0 %v1706_v1, %s1621_s26 }
 0x37e   :  { %v172_v24 = vpop.xlane.xlu1 %171 }
 0x37f   :  { %1534 = vrcp.f32 %v172_v24 }
 0x385   :  { %v1535_v26 = vpop.eup %1534 }
 0x386   :  { %v175_v25 = vpop.xlane.xlu0 %174  ;;  %v178_v28 = vmul.f32 %v1535_v26, %v1761_v45 }
 0x387   :  { %1536 = vrcp.f32 %v175_v25 }
 0x38d   :  { %v1537_v27 = vpop.eup %1536 }
 0x38e   :  { %v179_v29 = vmul.f32 %v1537_v27, %v1521_v48 }
 0x390   :  { %v180_v30 = vpack.c.bf16 %v179_v29, %v178_v28 }
 0x392   :  { %1306 = vmatmul.msk.bf16.vlgmr.msra.gmra.mxu2 %vm157_vm9, %v180_v30  ;;  %v1496_v30 = vld [vmem:[%s2044_s2 + $0x1] ss:$0 sm:$0xff] }
 0x393   :  { %v239_v32 = vpop.xlane.xlu1 %238 }
 0x394   :  { %1538 = vrcp.f32 %v239_v32 }
 0x396   :  { %v306_v43 = vpop.xlane.xlu2 %305 }
 0x39a   :  { %v1539_v34 = vpop.eup %1538 }
 0x39b   :  { %v245_v36 = vmul.f32 %v1539_v34, %v1523_v58 }
 0x39e   :  { %v309_v31 = vpop.xlane.xlu0 %308 }
 0x3a6   :  { %v242_v33 = vpop.xlane.xlu0 %241 }
 0x3a7   :  { %1540 = vrcp.f32 %v242_v33 }
 0x3ab   :  { %v383_v35 = vpop.permute.xlu1 %382 }
 0x3ac   :  { %395 = vmatpush.bf16.msra.mxu2 %v383_v35 }
 0x3ad   :  { %v1541_v1 = vpop.eup %1540 }
 0x3ae   :  { %v246_v37 = vmul.f32 %v1541_v1, %v1529_v13  ;;  %v373_v38 = vpop.xlane.xlu0 %372 }
 0x3af   :  { %1542 = vrcp.f32 %v373_v38 }
 0x3b0   :  { %v247_v39 = vpack.c.bf16 %v246_v37, %v245_v36 }
 0x3b2   :  { %1308 = vmatmul.msk.bf16.vlgmr.msrb.gmra.mxu2 %vm157_vm9, %v247_v39 }
 0x3b3   :  { %v453_v9 = vpop.permute.xlu1 %452 }
 0x3b4   :  { %465 = vmatpush.bf16.msra.mxu0 %v453_v9  ;;  %v1497_v9 = vld [vmem:[%s2044_s2 + $0x4] ss:$0 sm:$0xff] }
 0x3b5   :  { %v1543_v41 = vpop.eup %1542 }
 0x3b6   :  { %v376_v40 = vpop.xlane.xlu0 %375  ;;  %v379_v44 = vmul.f32 %v1543_v41, %v1531_v19 }
 0x3b7   :  { %1544 = vrcp.f32 %v376_v40 }
 0x3b8   :  { %1546 = vrcp.f32 %v309_v31 }
 0x3b9   :  { %1548 = vrcp.f32 %v306_v43 }
 0x3bd   :  { %v1545_v42 = vpop.eup %1544 }
 0x3be   :  { %v380_v45 = vmul.f32 %v1545_v42, %v1533_v21  ;;  %v1547_v47 = vpop.eup %1546 }
 0x3bf   :  { %v1549_v48 = vpop.eup %1548  ;;  %v313_v49 = vmul.f32 %v1547_v47, %v1771_v6  ;;  %v1315_v6 = vld [vmem:[%s2045_s3] sm:$0xf]  ;;  %v1444_v47 = vld [vmem:[%s2045_s3 + $0x18] sm:$0xf0] }
 0x3c0   :  { %v381_v46 = vpack.c.bf16 %v380_v45, %v379_v44  ;;  %v312_v50 = vmul.f32 %v1549_v48, %v1767_v63  ;;  %v1316_v8 = vor.u32 %v1441_v7, %v1315_v6 }
 0x3c2   :  { %1312 = vmatmul.msk.bf16.vlgmr.msra.gmra.mxu2 %vm157_vm9, %v381_v46  ;;  %v314_v52 = vpack.c.bf16 %v313_v49, %v312_v50 }
 0x3c9   :  { %v316_v51 = vpop.permute.xlu0 %315 }
 0x3ca   :  { %328 = vmatpush.bf16.msrb.mxu1 %v316_v51  ;;  %v1324_v51 = vld [vmem:[%s2045_s3 + $0x4] sm:$0xf] }
 0x3cd   :  { %1310 = vmatmul.msk.bf16.vlgmr.msrb.gmra.mxu1 %vm157_vm9, %v314_v52  ;;  %v1443_v52 = vld [vmem:[%s2045_s3 + $0x8] sm:$0xf0] }
 0x3ce   :  { %v1325_v56 = vor.u32 %v1443_v52, %v1324_v51 }
 0x415   :  { %v196_v58 = vpop.f32.mrf.mxu2 }
 0x41d   :  { %v198_v59 = vpop.f32.mrf.mxu2 }
 0x435   :  { %v263_v60 = vpop.f32.mrf.mxu2 }
 0x43d   :  { %v265_v61 = vpop.f32.mrf.mxu2 }
 0x43e   :  { %v1483_v62 = vpack.i.bf16 %v265_v61, %v263_v60 }
 0x440   :  { %1484 = vrot.lane.b32.xlu1 %v1483_v62, %s1623_s8 }
 0x445   :  { %v397_v63 = vpop.f32.mrf.mxu2 }
 0x44a   :  { %v330_v0 = vpop.f32.mrf.mxu1 }
 0x44d   :  { %v399_v2 = vpop.f32.mrf.mxu2 }
 0x44e   :  { %v1488_v3 = vpack.i.bf16 %v399_v2, %v397_v63 }
 0x450   :  { %1489 = vrot.lane.b32.xlu1 %v1488_v3, %s1624_s9 }
 0x452   :  { %v332_v4 = vpop.f32.mrf.mxu1 }
 0x453   :  { %v1478_v5 = vpack.i.bf16 %v332_v4, %v330_v0 }
 0x455   :  { %1479 = vrot.lane.b32.xlu0 %v1478_v5, %s1625_s10 }
 0x45d   :  { %450 = vrot.lane.b32.xlu0 %v1316_v8, %s1622_s7 }
 0x4b2   :  { %v1485_v11 = vpop.permute.xlu1 %1484 }
 0x4b3   :  { %v1487_v12 = vunpack.i.h.bf16 %v1485_v11  ;;  %v1486_v13 = vunpack.i.l.bf16 %v1485_v11 }
 0x4b5   :  { %v427_v20 = vsel %vm136_vm8, %v198_v59, %v1487_v12  ;;  %v426_v21 = vsel %vm136_vm8, %v196_v58, %v1486_v13 }
 0x4c2   :  { %v1490_v19 = vpop.permute.xlu1 %1489 }
 0x4c3   :  { %v1492_v24 = vunpack.i.h.bf16 %v1490_v19  ;;  %v1491_v25 = vunpack.i.l.bf16 %v1490_v19 }
 0x4c7   :  { %v1480_v15 = vpop.permute.xlu0 %1479 }
 0x4c8   :  { %v1482_v16 = vunpack.i.h.bf16 %v1480_v15  ;;  %v1481_v17 = vunpack.i.l.bf16 %v1480_v15  ;;  %v1498_v15 = vld [vmem:[%s2044_s2 + $0x5] ss:$0 sm:$0xff] }
 0x4ca   :  { %v429_v22 = vsel %vm157_vm9, %v427_v20, %v1482_v16  ;;  %v428_v23 = vsel %vm157_vm9, %v426_v21, %v1481_v17 }
 0x4cb   :  { %v432_v26 = vsel %vm430_vm10, %v429_v22, %v1492_v24  ;;  %v431_v27 = vsel %vm430_vm10, %v428_v23, %v1491_v25  ;;  %v1448_v23 = vld [vmem:[%s2046_s4 + $0x18] sm:$0xff]  ;;  %v1447_v24 = vld [vmem:[%s2046_s4 + $0x10] sm:$0xff]  ;;  %v1446_v25 = vld [vmem:[%s2046_s4 + $0x8] sm:$0xff] }
 0x4cc   :  { %v433_v29 = vpack.c.bf16 %v432_v26, %v431_v27  ;;  %624 = vmatpush.bf16.msra.mxu3 %v1448_v23  ;;  %v1445_v26 = vld [vmem:[%s2046_s4] sm:$0xff] }
 0x4cd   :  { %v1499_v27 = vld [vmem:[%s2044_s2 + $0x2] ss:$0 sm:$0xff] }
 0x4cf   :  { %v451_v28 = vpop.permute.xlu0 %450 }
 0x4d0   :  { %466 = vmatpush.bf16.msra.mxu0 %v451_v28  ;;  %625 = vmatpush.bf16.msra.mxu3 %v1447_v24 }
 0x4d3   :  { %1321 = vmatmul.msk.bf16.vlgmr.msra.gmra.mxu0 %vm33_vm0, %v433_v29 }
 0x4d4   :  { %626 = vmatpush.bf16.msra.mxu3 %v1446_v25 }
 0x4d8   :  { %627 = vmatpush.bf16.msra.mxu3 %v1445_v26 }
 0x550   :  { %v468_v31 = vpop.f32.mrf.mxu0 }
 0x551   :  { %v469_v32 = vadd.f32 %v1496_v30, %v468_v31 }
 0x553   :  { %v473_v33 = vadd.f32 %v469_v32, %v1696_v53 }
 0x555   :  { %v477_v34 = vsel %vm33_vm0, %v473_v33, 0.0 }
 0x556   :  { %478 = vadd.xlane.f32.xlu2 %v477_v34 }
 0x558   :  { %v470_v35 = vpop.f32.mrf.mxu0 }
 0x559   :  { %v471_v1 = vadd.f32 %v1496_v30, %v470_v35 }
 0x55b   :  { %v474_v36 = vadd.f32 %v471_v1, %v1698_v54  ;;  %v1328_v54 = vld [vmem:[%s2045_s3 + $0x14] sm:$0xf] }
 0x55c   :  { %v1329_v48 = vor.u32 %v1444_v47, %v1328_v54 }
 0x55d   :  { %v480_v37 = vsel %vm33_vm0, %v474_v36, 0.0 }
 0x55e   :  { %481 = vadd.xlane.f32.xlu1 %v480_v37  ;;  %555 = vmatpush.bf16.msra.mxu1 %v1329_v48  ;;  %v1500_v48 = vld [vmem:[%s2044_s2 + $0x3] ss:$0 sm:$0xff] }
 0x562   :  { %556 = vmatpush.bf16.msra.mxu1 %v1325_v56 }
 0x5c9   :  { %v479_v38 = vpop.xlane.xlu2 %478 }
 0x5ca   :  { %v483_v39 = vmul.f32 %v479_v38, %v1670_v10 }
 0x5cc   :  { %v485_v40 = vsub.f32 %v473_v33, %v483_v39 }
 0x5ce   :  { %v487_v41 = vmul.f32 %v485_v40, %v485_v40 }
 0x5d0   :  { %v489_v42 = vsel %vm33_vm0, %v487_v41, 0.0 }
 0x5d1   :  { %v482_v43 = vpop.xlane.xlu1 %481  ;;  %490 = vadd.xlane.f32.xlu0 %v489_v42 }
 0x5d2   :  { %v484_v53 = vmul.f32 %v482_v43, %v1670_v10 }
 0x5d4   :  { %v486_v44 = vsub.f32 %v474_v36, %v484_v53 }
 0x5d6   :  { %v488_v45 = vmul.f32 %v486_v44, %v486_v44 }
 0x5d8   :  { %v492_v46 = vsel %vm33_vm0, %v488_v45, 0.0 }
 0x5d9   :  { %493 = vadd.xlane.f32.xlu2 %v492_v46 }
 0x644   :  { %v491_v49 = vpop.xlane.xlu0 %490 }
 0x645   :  { %v495_v50 = vmul.f32 %v491_v49, %v1670_v10 }
 0x647   :  { %v497_v55 = vadd.f32 1e-12, %v495_v50 }
 0x649   :  { %1550 = vrsqrt.f32 %v497_v55  ;;  %vm505_vm12 = vweird.f32 %v497_v55 }
 0x64c   :  { %v494_v57 = vpop.xlane.xlu2 %493 }
 0x64d   :  { %v496_v58 = vmul.f32 %v494_v57, %v1670_v10 }
 0x64f   :  { %v1551_v59 = vpop.eup %1550  ;;  %v498_v60 = vadd.f32 1e-12, %v496_v58 }
 0x650   :  { %v500_v61 = vmul.f32 %v1551_v59, %v497_v55  ;;  %vm506_vm11 = vweird.f32 %v1551_v59 }
 0x651   :  { %1552 = vrsqrt.f32 %v498_v60  ;;  %vm507_vm13 = vmor %vm505_vm12, %vm506_vm11  ;;  %vm515_vm15 = vweird.f32 %v498_v60  ;;  %vm737_vm12 = vcmask 1041409  }
 0x652   :  { %v501_v62 = vmul.f32 %v1551_v59, %v500_v61 }
 0x654   :  { %v502_v63 = vmul.f32 0.5, %v501_v62 }
 0x656   :  { %v503_v0 = vsub.f32 1.5, %v502_v63 }
 0x657   :  { %v1553_v2 = vpop.eup %1552 }
 0x658   :  { %v504_v3 = vmul.f32 %v1551_v59, %v503_v0  ;;  %v510_v4 = vmul.f32 %v1553_v2, %v498_v60  ;;  %vm516_vm14 = vweird.f32 %v1553_v2 }
 0x659   :  { %vm517_vm1 = vmor %vm515_vm15, %vm516_vm14 }
 0x65a   :  { %v511_v5 = vmul.f32 %v1553_v2, %v510_v4  ;;  %v508_v6 = vsel %vm507_vm13, %v1551_v59, %v504_v3  ;;  %vm767_vm13 = vcmask 123904  }
 0x65b   :  { %v519_v11 = vmul.f32 %v508_v6, %v485_v40  ;;  %v1359_v6 = vld [vmem:[%s2045_s3 + $0x30] sm:$0xf] }
 0x65c   :  { %v512_v7 = vmul.f32 0.5, %v511_v5 }
 0x65d   :  { %v522_v16 = vmul.f32 %v1497_v9, %v519_v11 }
 0x65e   :  { %v513_v8 = vsub.f32 1.5, %v512_v7  ;;  %v1450_v7 = vld [vmem:[%s2045_s3 + $0x34] sm:$0xf0] }
 0x65f   :  { %v525_v20 = vadd.f32 %v1498_v15, %v522_v16 }
 0x660   :  { %v514_v12 = vmul.f32 %v1553_v2, %v513_v8  ;;  %v1360_v8 = vor.u32 %v1450_v7, %v1359_v6  ;;  %v745_v6 = vrot.slane %v1741_v18, 7 }
 0x662   :  { %v518_v13 = vsel %vm517_vm1, %v1553_v2, %v514_v12  ;;  %718 = vmatpush.bf16.msrb.mxu2 %v1360_v8  ;;  %v1355_v12 = vld [vmem:[%s2045_s3 + $0x20] sm:$0xf]  ;;  %v746_v7 = vsel %vm737_vm12, %v745_v6, %v1734_v14 }
 0x663   :  { %v520_v17 = vmul.f32 %v518_v13, %v486_v44  ;;  %v1449_v13 = vld [vmem:[%s2045_s3 + $0x24] sm:$0xf0] }
 0x664   :  { %v1356_v16 = vor.u32 %v1449_v13, %v1355_v12 }
 0x665   :  { %v523_v19 = vmul.f32 %v1497_v9, %v520_v17 }
 0x666   :  { %719 = vmatpush.bf16.msrb.mxu2 %v1356_v16 }
 0x667   :  { %v526_v21 = vadd.f32 %v1498_v15, %v523_v19 }
 0x669   :  { %v527_v22 = vpack.c.bf16 %v526_v21, %v525_v20 }
 0x66b   :  { %1330 = vmatmul.msk.bf16.vlgmr.msra.gmra.mxu1 %vm33_vm0, %v527_v22 }
 0x6e8   :  { %v558_v28 = vpop.f32.mrf.mxu1 }
 0x6e9   :  { %v559_v29 = vadd.f32 %v1499_v27, %v558_v28 }
 0x6eb   :  { %v565_v30 = vmul.f32 0.044715, %v559_v29  ;;  %v563_v53 = vmul.f32 0.5, %v559_v29 }
 0x6ed   :  { %v567_v31 = vmul.f32 %v565_v30, %v559_v29 }
 0x6ef   :  { %v569_v32 = vmul.f32 %v567_v31, %v559_v29 }
 0x6f0   :  { %v560_v33 = vpop.f32.mrf.mxu1 }
 0x6f1   :  { %v571_v34 = vadd.f32 %v569_v32, %v559_v29  ;;  %v561_v35 = vadd.f32 %v1499_v27, %v560_v33  ;;  %v1501_v33 = vld [vmem:[%s2044_s2 + $0x6] ss:$0 sm:$0xff] }
 0x6f3   :  { %v566_v1 = vmul.f32 0.044715, %v561_v35  ;;  %v573_v36 = vmul.f32 0.7978846, %v571_v34  ;;  %v564_v44 = vmul.f32 0.5, %v561_v35 }
 0x6f5   :  { %v568_v37 = vmul.f32 %v566_v1, %v561_v35  ;;  %1554 = vtanh.f32 %v573_v36  ;;  %v1502_v36 = vld [vmem:[%s2044_s2 + $0x7] ss:$0 sm:$0xff] }
 0x6f7   :  { %v570_v38 = vmul.f32 %v568_v37, %v561_v35 }
 0x6f9   :  { %v572_v39 = vadd.f32 %v570_v38, %v561_v35 }
 0x6fb   :  { %v574_v40 = vmul.f32 0.7978846, %v572_v39  ;;  %v1555_v41 = vpop.eup %1554 }
 0x6fc   :  { %v577_v42 = vadd.f32 1.0, %v1555_v41 }
 0x6fd   :  { %1556 = vtanh.f32 %v574_v40 }
 0x6fe   :  { %v579_v46 = vmul.f32 %v577_v42, %v563_v53  ;;  %v1503_v53 = vld [vmem:[%s2044_s2 + $0x8] ss:$0 sm:$0xff] }
 0x703   :  { %v1557_v43 = vpop.eup %1556 }
 0x704   :  { %v578_v45 = vadd.f32 1.0, %v1557_v43 }
 0x706   :  { %v580_v54 = vmul.f32 %v578_v45, %v564_v44 }
 0x708   :  { %v581_v47 = vpack.c.bf16 %v580_v54, %v579_v46 }
 0x70a   :  { %1347 = vmatmul.msk.bf16.vlgmr.msra.gmra.mxu3 %vm616_vm2, %v581_v47 }
 0x78d   :  { %v629_v49 = vpop.f32.mrf.mxu3 }
 0x78e   :  { %v630_v50 = vadd.f32 %v1500_v48, %v629_v49 }
 0x790   :  { %v634_v51 = vadd.f32 %v630_v50, %v525_v20 }
 0x792   :  { %v638_v52 = vsel %vm33_vm0, %v634_v51, 0.0 }
 0x793   :  { %639 = vadd.xlane.f32.xlu2 %v638_v52 }
 0x795   :  { %v631_v55 = vpop.f32.mrf.mxu3 }
 0x796   :  { %v632_v56 = vadd.f32 %v1500_v48, %v631_v55 }
 0x798   :  { %v635_v57 = vadd.f32 %v632_v56, %v526_v21 }
 0x79a   :  { %v641_v58 = vsel %vm33_vm0, %v635_v57, 0.0 }
 0x79b   :  { %642 = vadd.xlane.f32.xlu2 %v641_v58 }
 0x806   :  { %v640_v59 = vpop.xlane.xlu2 %639 }
 0x807   :  { %v644_v60 = vmul.f32 %v640_v59, %v1670_v10 }
 0x809   :  { %v646_v61 = vsub.f32 %v634_v51, %v644_v60 }
 0x80b   :  { %v648_v62 = vmul.f32 %v646_v61, %v646_v61 }
 0x80d   :  { %v650_v63 = vsel %vm33_vm0, %v648_v62, 0.0 }
 0x80e   :  { %651 = vadd.xlane.f32.xlu2 %v650_v63  ;;  %v643_v0 = vpop.xlane.xlu2 %642 }
 0x80f   :  { %v645_v2 = vmul.f32 %v643_v0, %v1670_v10 }
 0x811   :  { %v647_v3 = vsub.f32 %v635_v57, %v645_v2 }
 0x813   :  { %v649_v4 = vmul.f32 %v647_v3, %v647_v3 }
 0x815   :  { %v653_v5 = vsel %vm33_vm0, %v649_v4, 0.0 }
 0x816   :  { %654 = vadd.xlane.f32.xlu2 %v653_v5 }
 0x881   :  { %v652_v9 = vpop.xlane.xlu2 %651 }
 0x882   :  { %v656_v11 = vmul.f32 %v652_v9, %v1670_v10 }
 0x884   :  { %v658_v15 = vadd.f32 1e-12, %v656_v11 }
 0x886   :  { %1558 = vrsqrt.f32 %v658_v15  ;;  %vm666_vm4 = vweird.f32 %v658_v15 }
 0x889   :  { %v655_v17 = vpop.xlane.xlu2 %654 }
 0x88a   :  { %v657_v19 = vmul.f32 %v655_v17, %v1670_v10 }
 0x88c   :  { %v1559_v20 = vpop.eup %1558  ;;  %v659_v21 = vadd.f32 1e-12, %v657_v19 }
 0x88d   :  { %v661_v22 = vmul.f32 %v1559_v20, %v658_v15  ;;  %vm667_vm3 = vweird.f32 %v1559_v20 }
 0x88e   :  { %1560 = vrsqrt.f32 %v659_v21  ;;  %vm668_vm5 = vmor %vm666_vm4, %vm667_vm3  ;;  %vm676_vm7 = vweird.f32 %v659_v21 }
 0x88f   :  { %v662_v23 = vmul.f32 %v1559_v20, %v661_v22 }
 0x891   :  { %v663_v24 = vmul.f32 0.5, %v662_v23 }
 0x893   :  { %v664_v25 = vsub.f32 1.5, %v663_v24 }
 0x894   :  { %v1561_v26 = vpop.eup %1560 }
 0x895   :  { %v665_v27 = vmul.f32 %v1559_v20, %v664_v25  ;;  %v671_v28 = vmul.f32 %v1561_v26, %v659_v21  ;;  %vm677_vm6 = vweird.f32 %v1561_v26 }
 0x896   :  { %vm678_vm11 = vmor %vm676_vm7, %vm677_vm6 }
 0x897   :  { %v672_v29 = vmul.f32 %v1561_v26, %v671_v28  ;;  %v669_v30 = vsel %vm668_vm5, %v1559_v20, %v665_v27 }
 0x898   :  { %v680_v34 = vmul.f32 %v669_v30, %v646_v61 }
 0x899   :  { %v673_v31 = vmul.f32 0.5, %v672_v29 }
 0x89a   :  { %v683_v37 = vmul.f32 %v1501_v33, %v680_v34 }
 0x89b   :  { %v674_v32 = vsub.f32 1.5, %v673_v31 }
 0x89c   :  { %v1890_v40 = vadd.f32 %v1502_v36, %v683_v37 }
 0x89d   :  { %v675_v35 = vmul.f32 %v1561_v26, %v674_v32 }
 0x89f   :  { %v679_v1 = vsel %vm678_vm11, %v1561_v26, %v675_v35 }
 0x8a0   :  { %v681_v38 = vmul.f32 %v679_v1, %v647_v3 }
 0x8a2   :  { %v684_v39 = vmul.f32 %v1501_v33, %v681_v38 }
 0x8a4   :  { %v1892_v41 = vadd.f32 %v1502_v36, %v684_v39 }
 0x8a6   :  { %v688_v42 = vpack.c.bf16 %v1892_v41, %v1890_v40 }
 0x8a8   :  { %1361 = vmatmul.msk.bf16.vlgmr.msrb.gmra.mxu2 %vm33_vm0, %v688_v42 }
 0x92b   :  { %v721_v43 = vpop.f32.mrf.mxu2 }
 0x92c   :  { %v722_v44 = vadd.f32 %v1503_v53, %v721_v43 }
 0x92e   :  { %v726_v46 = vpack.c.bf16 %v722_v44, %v722_v44 }
 0x930   :  { %v730_v48 = vunpack.c.l.b16 %v726_v46 }
 0x932   :  { %v1362_v52 = vunpack.i.l.s16 %v730_v48 }
 0x933   :  { %v723_v45 = vpop.f32.mrf.mxu2 }
 0x934   :  { %v724_v54 = vadd.f32 %v1503_v53, %v723_v45 }
 0x936   :  { %v727_v47 = vpack.c.bf16 %v724_v54, %v724_v54 }
 0x938   :  { %v731_v49 = vunpack.c.l.b16 %v727_v47 }
 0x93a   :  { %v1363_v50 = vunpack.i.l.s16 %v731_v49  ;;  %v1900_v51 = vpack.c.b16 %v731_v49, %v730_v48 }
 0x93c   :  { %v736_v55 = vrot.slane %v1363_v50, 7  ;;  %741 = vrot.lane.b32.xlu0 %v1900_v51, %s1613_s16  ;;  %801 = vrot.lane.b32.xlu1 %v1900_v51, %s1614_s17 }
 0x93e   :  { %v738_v56 = vsel %vm737_vm12, %v736_v55, %v1362_v52 }
 0x93f   :  { %v739_v57 = vpack.c.b16 %v738_v56, %v738_v56 }
 0x941   :  { %799 = vrot.lane.b32.xlu2 %v739_v57, %s1612_s15 }
 0x944   :  { %909 = vrot.lane.b32.xlu1 %v1900_v51, %s1611_s14  ;;  %907 = vrot.lane.b32.xlu0 %v739_v57, %s1615_s18 }
 0x949   :  { %855 = vrot.lane.b32.xlu2 %v1900_v51, %s1616_s19 }
 0x94c   :  { %853 = vrot.lane.b32.xlu1 %v739_v57, %s1617_s20 }
 0x99b   :  { %v800_v58 = vpop.permute.xlu2 %799 }
 0x9a3   :  { %v856_v59 = vpop.permute.xlu2 %855 }
 0x9a4   :  { %v861_v0 = vsel %vm136_vm8, %v856_v59, 0 }
 0x9ae   :  { %v742_v60 = vpop.permute.xlu0 %741  ;;  %v802_v61 = vpop.permute.xlu1 %801 }
 0x9af   :  { %v752_v62 = vsel %vm136_vm8, %v742_v60, 0  ;;  %v807_v63 = vsel %vm136_vm8, %v802_v61, 0 }
 0x9b0   :  { %761 = vmatpush.bf16.xpose.msrb.mxu0 %v752_v62  ;;  %816 = vmatpush.bf16.xpose.msrb.mxu3 %v807_v63 }
 0x9b6   :  { %v910_v2 = vpop.permute.xlu1 %909  ;;  %v908_v4 = vpop.permute.xlu0 %907 }
 0x9b7   :  { %v915_v3 = vsel %vm136_vm8, %v910_v2, 0  ;;  %1364 = vmatmul.msk.bf16.vlgmr.msrb.gmra.mxu0 %vm136_vm8, %v739_v57  ;;  %1366 = vmatmul.msk.bf16.vlgmr.msrb.gmra.mxu3 %vm136_vm8, %v800_v58 }
 0x9b8   :  { %870 = vmatpush.bf16.xpose.msra.mxu0 %v861_v0  ;;  %924 = vmatpush.bf16.xpose.msra.mxu3 %v915_v3  ;;  %v1383_v3 = vld [vmem:[%s2045_s3 + $0x30] sm:$0xf] }
 0x9be   :  { %v854_v5 = vpop.permute.xlu1 %853 }
 0x9c7   :  { %1368 = vmatmul.msk.bf16.vlgmr.msra.gmra.mxu0 %vm136_vm8, %v854_v5  ;;  %1370 = vmatmul.msk.bf16.vlgmr.msra.gmra.mxu3 %vm136_vm8, %v908_v4  ;;  %v1452_v4 = vld [vmem:[%s2045_s3 + $0x34] sm:$0xf0] }
 0x9c8   :  { %v1384_v5 = vor.u32 %v1452_v4, %v1383_v3 }
 0xa34   :  { %v763_v8 = vpop.f32.mrf.mxu0 }
 0xa35   :  { %v764_v9 = vadd.f32 %v763_v8, %v746_v7 }
 0xa37   :  { %v768_v11 = vsel %vm767_vm13, %v764_v9, -inf }
 0xa38   :  { %769 = vmax.xlane.f32.xlu2 %v768_v11 }
 0xa3a   :  { %v818_v12 = vpop.f32.mrf.mxu3 }
 0xa3b   :  { %v819_v13 = vadd.f32 %v818_v12, %v746_v7 }
 0xa3c   :  { %v765_v15 = vpop.f32.mrf.mxu0 }
 0xa3d   :  { %v822_v16 = vsel %vm767_vm13, %v819_v13, -inf  ;;  %v1379_v15 = vld [vmem:[%s2045_s3 + $0x20] sm:$0xf] }
 0xa3e   :  { %823 = vmax.xlane.f32.xlu0 %v822_v16  ;;  %v1451_v16 = vld [vmem:[%s2045_s3 + $0x24] sm:$0xf0] }
 0xa42   :  { %v820_v17 = vpop.f32.mrf.mxu3 }
 0xa43   :  { %v1380_v17 = vor.u32 %v1451_v16, %v1379_v15 }
 0xa44   :  { %v872_v19 = vpop.f32.mrf.mxu0 }
 0xa45   :  { %v873_v20 = vadd.f32 %v872_v19, %v746_v7 }
 0xa47   :  { %v876_v18 = vsel %vm767_vm13, %v873_v20, -inf }
 0xa48   :  { %877 = vmax.xlane.f32.xlu0 %v876_v18 }
 0xa4a   :  { %v926_v21 = vpop.f32.mrf.mxu3 }
 0xa4b   :  { %v927_v14 = vadd.f32 %v926_v21, %v746_v7 }
 0xa4c   :  { %v874_v22 = vpop.f32.mrf.mxu0 }
 0xa4d   :  { %v930_v23 = vsel %vm767_vm13, %v927_v14, -inf }
 0xa4e   :  { %931 = vmax.xlane.f32.xlu1 %v930_v23 }
 0xa52   :  { %v928_v24 = vpop.f32.mrf.mxu3 }
 0xa5c   :  { %834 = vrot.lane.b32.xlu0 %v1900_v51, %s1619_s0 }
 0xa64   :  { %942 = vrot.lane.b32.xlu0 %v1900_v51, %s1620_s25 }
 0xaab   :  { %v770_v25 = vpop.xlane.xlu2 %769 }
 0xaac   :  { %v771_v26 = vsub.f32 %v764_v9, %v770_v25 }
 0xaae   :  { %v772_v27 = vmul.f32 1.442695, %v771_v26 }
 0xab0   :  { %1562 = vpow2.f32 %v772_v27  ;;  %v1504_v27 = vld [vmem:[%s2044_s2 + $0x9] ss:$0 sm:$0xff] }
 0xab1   :  { %v824_v28 = vpop.xlane.xlu0 %823 }
 0xab2   :  { %v825_v29 = vsub.f32 %v819_v13, %v824_v28 }
 0xab4   :  { %v826_v30 = vmul.f32 1.442695, %v825_v29 }
 0xab6   :  { %v1563_v31 = vpop.eup %1562  ;;  %1564 = vpow2.f32 %v826_v30 }
 0xab7   :  { %v774_v32 = vsel %vm767_vm13, %v1563_v31, 0.0 }
 0xab8   :  { %775 = vadd.xlane.f32.xlu1 %v774_v32 }
 0xabb   :  { %v878_v33 = vpop.xlane.xlu0 %877 }
 0xabc   :  { %v1565_v34 = vpop.eup %1564  ;;  %v879_v35 = vsub.f32 %v873_v20, %v878_v33 }
 0xabd   :  { %v828_v1 = vsel %vm767_vm13, %v1565_v34, 0.0 }
 0xabe   :  { %v880_v36 = vmul.f32 1.442695, %v879_v35  ;;  %829 = vadd.xlane.f32.xlu2 %v828_v1 }
 0xac0   :  { %1566 = vpow2.f32 %v880_v36 }
 0xac1   :  { %v932_v37 = vpop.xlane.xlu1 %931 }
 0xac2   :  { %v933_v38 = vsub.f32 %v927_v14, %v932_v37 }
 0xac4   :  { %v934_v39 = vmul.f32 1.442695, %v933_v38 }
 0xac6   :  { %v1567_v42 = vpop.eup %1566  ;;  %1568 = vpow2.f32 %v934_v39 }
 0xac7   :  { %v882_v43 = vsel %vm767_vm13, %v1567_v42, 0.0 }
 0xac8   :  { %883 = vadd.xlane.f32.xlu1 %v882_v43 }
 0xacc   :  { %v1569_v53 = vpop.eup %1568 }
 0xacd   :  { %v936_v45 = vsel %vm767_vm13, %v1569_v53, 0.0 }
 0xace   :  { %v835_v44 = vpop.permute.xlu0 %834 }
 0xacf   :  { %847 = vmatpush.bf16.msra.mxu2 %v835_v44 }
 0xad0   :  { %937 = vadd.xlane.f32.xlu1 %v936_v45  ;;  %v1399_v45 = vld [vmem:[%s2045_s3 + $0x34] sm:$0xf] }
 0xad6   :  { %v943_v46 = vpop.permute.xlu0 %942  ;;  %780 = vrot.lane.b32.xlu2 %v1900_v51, %s1618_s1 }
 0xad7   :  { %955 = vmatpush.bf16.msrb.mxu2 %v943_v46  ;;  %v1454_v46 = vld [vmem:[%s2045_s3 + $0x38] sm:$0xf0] }
 0xade   :  { %995 = vrot.lane.b32.xlu2 %v1384_v5, %s1622_s7 }
 0xae9   :  { %888 = vrot.lane.b32.xlu1 %v1900_v51, %s1621_s26 }
 0xb2b   :  { %v776_v54 = vpop.xlane.xlu1 %775 }
 0xb2c   :  { %1570 = vrcp.f32 %v776_v54  ;;  %v1395_v54 = vld [vmem:[%s2045_s3 + $0x24] sm:$0xf] }
 0xb31   :  { %v830_v47 = vpop.xlane.xlu2 %829 }
 0xb32   :  { %1572 = vrcp.f32 %v830_v47  ;;  %v1571_v48 = vpop.eup %1570 }
 0xb33   :  { %v778_v49 = vmul.f32 %v1571_v48, %v1563_v31  ;;  %v1400_v48 = vor.u32 %v1454_v46, %v1399_v45 }
 0xb35   :  { %v779_v56 = vpack.c.bf16 %v778_v49, %v778_v49  ;;  %v1453_v49 = vld [vmem:[%s2045_s3 + $0x28] sm:$0xf0] }
 0xb38   :  { %v1573_v50 = vpop.eup %1572 }
 0xb39   :  { %v832_v52 = vmul.f32 %v1573_v50, %v1565_v34  ;;  %v781_v55 = vpop.permute.xlu2 %780 }
 0xb3a   :  { %793 = vmatpush.bf16.msrb.mxu1 %v781_v55 }
 0xb3b   :  { %v833_v57 = vpack.c.bf16 %v832_v52, %v832_v52  ;;  %v884_v58 = vpop.xlane.xlu1 %883  ;;  %v1396_v52 = vor.u32 %v1453_v49, %v1395_v54 }
 0xb3d   :  { %1365 = vmatmul.msk.bf16.vlgmr.msrb.gmra.mxu1 %vm157_vm9, %v779_v56  ;;  %1367 = vmatmul.msk.bf16.vlgmr.msra.gmra.mxu2 %vm157_vm9, %v833_v57 }
 0xb41   :  { %v996_v20 = vpop.permute.xlu2 %995 }
 0xb42   :  { %1008 = vmatpush.bf16.msrb.mxu0 %v996_v20  ;;  %v1456_v20 = vld [vmem:[%s2046_s4 + $0x28] sm:$0xff] }
 0xb43   :  { %v938_v59 = vpop.xlane.xlu1 %937 }
 0xb44   :  { %1574 = vrcp.f32 %v938_v59 }
 0xb45   :  { %1576 = vrcp.f32 %v884_v58 }
 0xb4a   :  { %v1575_v51 = vpop.eup %1574 }
 0xb4b   :  { %v940_v60 = vmul.f32 %v1575_v51, %v1569_v53  ;;  %v1577_v62 = vpop.eup %1576 }
 0xb4c   :  { %v886_v63 = vmul.f32 %v1577_v62, %v1567_v42 }
 0xb4d   :  { %v941_v61 = vpack.c.bf16 %v940_v60, %v940_v60 }
 0xb4e   :  { %v887_v2 = vpack.c.bf16 %v886_v63, %v886_v63  ;;  %v1506_v63 = vld [vmem:[%s2044_s2 + $0xd] ss:$0 sm:$0xff] }
 0xb4f   :  { %1371 = vmatmul.msk.bf16.vlgmr.msrb.gmra.mxu2 %vm157_vm9, %v941_v61  ;;  %v1505_v61 = vld [vmem:[%s2044_s2 + $0xc] ss:$0 sm:$0xff] }
 0xb5b   :  { %v889_v0 = vpop.permute.xlu1 %888 }
 0xb5c   :  { %901 = vmatpush.bf16.msra.mxu1 %v889_v0 }
 0xb5f   :  { %1369 = vmatmul.msk.bf16.vlgmr.msra.gmra.mxu1 %vm157_vm9, %v887_v2 }
 0xb60   :  { %1109 = vmatpush.bf16.msrb.mxu1 %v1400_v48 }
 0xb64   :  { %1110 = vmatpush.bf16.msrb.mxu1 %v1396_v52 }
 0xbba   :  { %v795_v6 = vpop.f32.mrf.mxu1 }
 0xbc0   :  { %v849_v7 = vpop.f32.mrf.mxu2 }
 0xbc1   :  { %962 = vrot.lane.b32.xlu0 %v849_v7, %s1623_s8 }
 0xbc2   :  { %v797_v8 = vpop.f32.mrf.mxu1 }
 0xbc8   :  { %v851_v9 = vpop.f32.mrf.mxu2 }
 0xbd2   :  { %v957_v11 = vpop.f32.mrf.mxu2 }
 0xbd3   :  { %970 = vrot.lane.b32.xlu0 %v957_v11, %s1624_s9 }
 0xbda   :  { %v959_v12 = vpop.f32.mrf.mxu2 }
 0xbdc   :  { %v903_v13 = vpop.f32.mrf.mxu1 }
 0xbdd   :  { %966 = vrot.lane.b32.xlu2 %v903_v13, %s1625_s10 }
 0xbe4   :  { %v905_v19 = vpop.f32.mrf.mxu1 }
 0xbe5   :  { %993 = vrot.lane.b32.xlu2 %v1380_v17, %s1622_s7  ;;  %v1458_v17 = vld [vmem:[%s2046_s4 + $0x38] sm:$0xff]  ;;  %v1457_v19 = vld [vmem:[%s2046_s4 + $0x30] sm:$0xff] }
 0xbe6   :  { %1168 = vmatpush.bf16.msrb.mxu3 %v1458_v17 }
 0xbea   :  { %1169 = vmatpush.bf16.msrb.mxu3 %v1457_v19 }
 0xbee   :  { %1170 = vmatpush.bf16.msrb.mxu3 %v1456_v20  ;;  %v1511_v20 = vld [vmem:[%s2044_s2 + $0x12] ss:$0 sm:$0xff] }
 0xc33   :  { %v963_v21 = vpop.permute.xlu0 %962 }
 0xc34   :  { %v973_v22 = vsel %vm136_vm8, %v795_v6, %v963_v21  ;;  %vm1028_vm8 = vcmask 254976   ;;  %v1507_v21 = vld [vmem:[%s2044_s2 + $0xa] ss:$0 sm:$0xff] }
 0xc37   :  { %v967_v18 = vpop.permute.xlu2 %966 }
 0xc38   :  { %v974_v23 = vsel %vm157_vm9, %v973_v22, %v967_v18  ;;  %v1455_v18 = vld [vmem:[%s2046_s4 + $0x20] sm:$0xff] }
 0xc39   :  { %1171 = vmatpush.bf16.msrb.mxu3 %v1455_v18 }
 0xc3f   :  { %v994_v14 = vpop.permute.xlu2 %993 }
 0xc40   :  { %1009 = vmatpush.bf16.msrb.mxu0 %v994_v14 }
 0xc45   :  { %v971_v24 = vpop.permute.xlu0 %970 }
 0xc46   :  { %v975_v25 = vsel %vm430_vm10, %v974_v23, %v971_v24 }
 0xc47   :  { %v976_v26 = vpack.c.bf16 %v975_v25, %v975_v25 }
 0xc49   :  { %1385 = vmatmul.msk.bf16.vlgmr.msrb.gmra.mxu0 %vm33_vm0, %v976_v26 }
 0xcc6   :  { %v1011_v28 = vpop.f32.mrf.mxu0 }
 0xcc7   :  { %v1012_v29 = vadd.f32 %v1504_v27, %v1011_v28 }
 0xcc9   :  { %v1016_v30 = vrot.slane %v1012_v29, 1  ;;  %v1019_v32 = vadd.f32 %v1012_v29, %v1890_v40 }
 0xccb   :  { %v1020_v31 = vadd.f32 %v1016_v30, %v1892_v41 }
 0xccd   :  { %v1025_v33 = vrot.slane %v1020_v31, 7 }
 0xcce   :  { %v1013_v34 = vpop.f32.mrf.mxu0 }
 0xccf   :  { %v1026_v35 = vsel %vm737_vm12, %v1025_v33, %v1019_v32  ;;  %v1508_v34 = vld [vmem:[%s2044_s2 + $0xb] ss:$0 sm:$0xff] }
 0xcd0   :  { %v1029_v1 = vsel %vm1028_vm8, %v1026_v35, 0.0 }
 0xcd1   :  { %1030 = vadd.xlane.f32.xlu0 %v1029_v1 }
 0xd44   :  { %v1031_v36 = vpop.xlane.xlu0 %1030 }
 0xd45   :  { %v1032_v37 = vmul.f32 %v1031_v36, %v1670_v10 }
 0xd47   :  { %v1034_v38 = vrot.slane %v1032_v37, 1  ;;  %v1037_v39 = vsub.f32 %v1019_v32, %v1032_v37 }
 0xd49   :  { %v1038_v42 = vsub.f32 %v1020_v31, %v1034_v38  ;;  %v1039_v53 = vmul.f32 %v1037_v39, %v1037_v39 }
 0xd4b   :  { %v1040_v43 = vmul.f32 %v1038_v42, %v1038_v42 }
 0xd4d   :  { %v1043_v44 = vrot.slane %v1040_v43, 7 }
 0xd4f   :  { %v1044_v41 = vsel %vm737_vm12, %v1043_v44, %v1039_v53 }
 0xd50   :  { %v1046_v40 = vsel %vm1028_vm8, %v1044_v41, 0.0 }
 0xd51   :  { %1047 = vadd.xlane.f32.xlu1 %v1046_v40 }
 0xdc4   :  { %v1048_v47 = vpop.xlane.xlu1 %1047 }
 0xdc5   :  { %v1049_v50 = vmul.f32 %v1048_v47, %v1670_v10 }
 0xdc7   :  { %v1050_v55 = vadd.f32 1e-12, %v1049_v50 }
 0xdc9   :  { %1578 = vrsqrt.f32 %v1050_v55  ;;  %vm1057_vm10 = vweird.f32 %v1050_v55 }
 0xdcf   :  { %v1579_v56 = vpop.eup %1578 }
 0xdd0   :  { %v1052_v57 = vmul.f32 %v1579_v56, %v1050_v55  ;;  %vm1058_vm9 = vweird.f32 %v1579_v56  ;;  %v1460_v55 = vld [vmem:[%s2047_s5 + $0x8] sm:$0xff] }
 0xdd1   :  { %vm1059_vm14 = vmor %vm1057_vm10, %vm1058_vm9  ;;  %1269 = vmatpush.bf16.msra.mxu2 %v1460_v55 }
 0xdd2   :  { %v1053_v58 = vmul.f32 %v1579_v56, %v1052_v57  ;;  %v1459_v57 = vld [vmem:[%s2047_s5] sm:$0xff] }
 0xdd4   :  { %v1054_v59 = vmul.f32 0.5, %v1053_v58 }
 0xdd5   :  { %1270 = vmatpush.bf16.msra.mxu2 %v1459_v57 }
 0xdd6   :  { %v1055_v51 = vsub.f32 1.5, %v1054_v59 }
 0xdd8   :  { %v1056_v60 = vmul.f32 %v1579_v56, %v1055_v51 }
 0xdda   :  { %v1060_v62 = vsel %vm1059_vm14, %v1579_v56, %v1056_v60 }
 0xddb   :  { %v1062_v0 = vrot.slane %v1060_v62, 1  ;;  %v1065_v2 = vmul.f32 %v1060_v62, %v1037_v39 }
 0xddd   :  { %v1066_v3 = vmul.f32 %v1062_v0, %v1038_v42  ;;  %v1068_v4 = vmul.f32 %v1505_v61, %v1065_v2  ;;  %v1510_v2 = vld [vmem:[%s2044_s2 + $0xf] ss:$0 sm:$0xff] }
 0xddf   :  { %v1069_v5 = vmul.f32 %v1505_v61, %v1066_v3  ;;  %v1071_v6 = vadd.f32 %v1506_v63, %v1068_v4 }
 0xde1   :  { %v1072_v7 = vadd.f32 %v1506_v63, %v1069_v5  ;;  %v1073_v8 = vpack.c.bf16 %v1071_v6, %v1071_v6 }
 0xde3   :  { %v1074_v9 = vpack.c.bf16 %v1072_v7, %v1072_v7  ;;  %v1083_v12 = vunpack.c.l.b16 %v1073_v8 }
 0xde5   :  { %v1084_v11 = vunpack.c.l.b16 %v1074_v9 }
 0xde7   :  { %v1085_v13 = vrot.slane %v1084_v11, 7 }
 0xde9   :  { %v1086_v15 = vsel %vm737_vm12, %v1085_v13, %v1083_v12 }
 0xdea   :  { %v1087_v16 = vpack.c.b16 %v1086_v15, %v1086_v15 }
 0xdec   :  { %1401 = vmatmul.msk.bf16.vlgmr.msrb.gmra.mxu1 %vm33_vm0, %v1087_v16 }
 0xe69   :  { %v1112_v14 = vpop.f32.mrf.mxu1 }
 0xe6a   :  { %v1113_v22 = vadd.f32 %v1507_v21, %v1112_v14 }
 0xe6c   :  { %v1117_v23 = vmul.f32 0.044715, %v1113_v22  ;;  %v1116_v30 = vmul.f32 0.5, %v1113_v22 }
 0xe6e   :  { %v1118_v24 = vmul.f32 %v1117_v23, %v1113_v22 }
 0xe70   :  { %v1119_v25 = vmul.f32 %v1118_v24, %v1113_v22 }
 0xe71   :  { %v1114_v26 = vpop.f32.mrf.mxu1 }
 0xe72   :  { %v1120_v27 = vadd.f32 %v1119_v25, %v1113_v22 }
 0xe74   :  { %v1121_v28 = vmul.f32 0.7978846, %v1120_v27 }
 0xe76   :  { %1580 = vtanh.f32 %v1121_v28 }
 0xe7c   :  { %v1581_v29 = vpop.eup %1580 }
 0xe7d   :  { %v1123_v31 = vadd.f32 1.0, %v1581_v29 }
 0xe7f   :  { %v1124_v32 = vmul.f32 %v1123_v31, %v1116_v30 }
 0xe81   :  { %v1125_v33 = vpack.c.bf16 %v1124_v32, %v1124_v32 }
 0xe83   :  { %1427 = vmatmul.msk.bf16.vlgmr.msrb.gmra.mxu3 %vm616_vm2, %v1125_v33 }
 0xf06   :  { %v1173_v35 = vpop.f32.mrf.mxu3 }
 0xf07   :  { %v1174_v1 = vadd.f32 %v1508_v34, %v1173_v35 }
 0xf09   :  { %v1178_v36 = vrot.slane %v1174_v1, 1  ;;  %v1181_v38 = vadd.f32 %v1174_v1, %v1071_v6 }
 0xf0b   :  { %v1182_v37 = vadd.f32 %v1178_v36, %v1072_v7 }
 0xf0d   :  { %v1187_v39 = vrot.slane %v1182_v37, 7 }
 0xf0e   :  { %v1175_v42 = vpop.f32.mrf.mxu3 }
 0xf0f   :  { %v1188_v43 = vsel %vm737_vm12, %v1187_v39, %v1181_v38 }
 0xf10   :  { %v1190_v53 = vsel %vm1028_vm8, %v1188_v43, 0.0 }
 0xf11   :  { %1191 = vadd.xlane.f32.xlu2 %v1190_v53 }
 0xf84   :  { %v1192_v44 = vpop.xlane.xlu2 %1191 }
 0xf85   :  { %v1193_v41 = vmul.f32 %v1192_v44, %v1670_v10 }
 0xf87   :  { %v1195_v40 = vrot.slane %v1193_v41, 1  ;;  %v1198_v45 = vsub.f32 %v1181_v38, %v1193_v41 }
 0xf89   :  { %v1199_v46 = vsub.f32 %v1182_v37, %v1195_v40  ;;  %v1200_v47 = vmul.f32 %v1198_v45, %v1198_v45 }
 0xf8b   :  { %v1201_v54 = vmul.f32 %v1199_v46, %v1199_v46 }
 0xf8d   :  { %v1204_v48 = vrot.slane %v1201_v54, 7 }
 0xf8f   :  { %v1205_v49 = vsel %vm737_vm12, %v1204_v48, %v1200_v47 }
 0xf90   :  { %v1207_v50 = vsel %vm1028_vm8, %v1205_v49, 0.0 }
 0xf91   :  { %1208 = vadd.xlane.f32.xlu0 %v1207_v50 }
0x1004   :  { %v1209_v52 = vpop.xlane.xlu0 %1208 }
0x1005   :  { %v1210_v56 = vmul.f32 %v1209_v52, %v1670_v10  ;;  %v1509_v10 = vld [vmem:[%s2044_s2 + $0xe] ss:$0 sm:$0xff] }
0x1007   :  { %v1211_v58 = vadd.f32 1e-12, %v1210_v56 }
0x1009   :  { %1582 = vrsqrt.f32 %v1211_v58  ;;  %vm1218_vm1 = vweird.f32 %v1211_v58 }
0x100f   :  { %v1583_v59 = vpop.eup %1582 }
0x1010   :  { %v1213_v51 = vmul.f32 %v1583_v59, %v1211_v58  ;;  %vm1219_vm15 = vweird.f32 %v1583_v59 }
0x1011   :  { %vm1220_vm2 = vmor %vm1218_vm1, %vm1219_vm15 }
0x1012   :  { %v1214_v60 = vmul.f32 %v1583_v59, %v1213_v51 }
0x1014   :  { %v1215_v61 = vmul.f32 0.5, %v1214_v60 }
0x1016   :  { %v1216_v62 = vsub.f32 1.5, %v1215_v61 }
0x1018   :  { %v1217_v63 = vmul.f32 %v1583_v59, %v1216_v62 }
0x101a   :  { %v1221_v0 = vsel %vm1220_vm2, %v1583_v59, %v1217_v63 }
0x101b   :  { %v1223_v3 = vrot.slane %v1221_v0, 1  ;;  %v1226_v4 = vmul.f32 %v1221_v0, %v1198_v45 }
0x101d   :  { %v1227_v5 = vmul.f32 %v1223_v3, %v1199_v46  ;;  %v1229_v6 = vmul.f32 %v1509_v10, %v1226_v4 }
0x101f   :  { %v1230_v7 = vmul.f32 %v1509_v10, %v1227_v5  ;;  %v1232_v8 = vadd.f32 %v1510_v2, %v1229_v6 }
0x1021   :  { %v1233_v9 = vadd.f32 %v1510_v2, %v1230_v7  ;;  %v1234_v11 = vpack.c.bf16 %v1232_v8, %v1232_v8 }
0x1023   :  { %v1235_v12 = vpack.c.bf16 %v1233_v9, %v1233_v9  ;;  %v1243_v15 = vunpack.c.l.b16 %v1234_v11 }
0x1025   :  { %v1244_v13 = vunpack.c.l.b16 %v1235_v12 }
0x1027   :  { %v1245_v16 = vrot.slane %v1244_v13, 7 }
0x1029   :  { %v1246_v17 = vsel %vm737_vm12, %v1245_v16, %v1243_v15 }
0x102a   :  { %v1247_v19 = vpack.c.b16 %v1246_v17, %v1246_v17 }
0x102c   :  { %1438 = vmatmul.msk.bf16.vlgmr.msra.gmra.mxu2 %vm33_vm0, %v1247_v19 }
0x10af   :  { %v1272_v18 = vpop.f32.mrf.mxu2 }
0x10b0   :  { %v1273_v21 = vadd.f32 %v1511_v20, %v1272_v18 }
0x10b2   :  { %1276 = vst [vmem:[#allocation2] sm:$0x3] %v1273_v21 }
0x10b3   :  { %1287 = dma.vmem_to_hbm [thread:$0]  %s1283_s12, 32, %s1285_s22, [#allocation3]  }
0x10b7   :  { %v1274_v14 = vpop.f32.mrf.mxu2 }
0x10b8   :  { %1608 = dma.done.wait [#allocation3], 32  }
0x10b9   :  { %1609 = vsyncadd [#allocation3], 4294967264 }
0x10ba   :  { %1292 = vsyncpa [#allocation3], 1 }

</bundles_post_ra>
